<compile_context>
chip_gen: v7x
topology: tpu7x:2x2x1
jax: 0.10.0
libtpu: 0.0.40
codegen_flags: <defaults>
</compile_context>

<pallas_src>
import functools

import jax
import jax.numpy as jnp
from jax import lax
from jax.experimental import pallas as pl
from jax.experimental.pallas import tpu as pltpu


_MXU_MIN_K = 128  # contraction size below which a VPU broadcast-MAC beats MXU push/drain


def _silu(x, approx):
    xf = x.astype(jnp.float32)
    if approx:
        # exp and reciprocal both run on the EUP slot (otherwise idle), freeing
        # VALU slots for the pool's max/select chain.
        return xf * pl.reciprocal(1.0 + jnp.exp(-xf), approx=True)
    return xf * jax.nn.sigmoid(xf)


def _matmul_1x1(w, x):
    """(O, K) @ (K, P) -> (O, P) with f32 accumulation.

    Gate the MXU on the contraction dim only: a K-tiny / O-large dot runs at
    <=K/256 MXU utilization while still paying push/drain latency, so tiny-K
    channel counts use an unrolled VPU broadcast-multiply-accumulate instead.
    """
    O, K = w.shape
    if K >= _MXU_MIN_K:
        return jnp.dot(w, x, preferred_element_type=jnp.float32)
    acc = w[:, 0:1].astype(jnp.float32) * x[0:1, :].astype(jnp.float32)
    for k in range(1, K):
        acc = acc + w[:, k:k + 1].astype(jnp.float32) * x[k:k + 1, :].astype(jnp.float32)
    return acc


def _pool_masks(HWp, H, W):
    """Boundary masks for the +/-1, +/-2 taps; shape (1, HWp), broadcast in where.

    Masks use the *actual* H*W, so lanes in the pad region (HW <= pos < HWp)
    are never read by any valid position's tap.  Built once per grid step and
    reused by all three cascaded pools.
    """
    HW = H * W
    pos = lax.broadcasted_iota(jnp.int32, (1, HWp), 1)
    if W & (W - 1) == 0:
        col = jnp.bitwise_and(pos, W - 1)
    else:
        col = pos % W
    # order: tap offsets (-2, -1, +1, +2)
    w_masks = (col >= 2, col >= 1, col < W - 1, col < W - 2)
    h_masks = (pos >= 2 * W, pos >= W, pos < HW - W, pos < HW - 2 * W)
    return w_masks, h_masks


def _maxpool5_flat(a, w_masks, h_masks, W):
    """5x5 max pool, stride 1, 'same' padding, on the flat (C, H*W[+pad]) layout."""
    HWp = a.shape[-1]
    neg = jnp.asarray(-jnp.inf, a.dtype)

    def tap(src, d, mask):
        # shifted[p] = src[p + d]  (jnp.roll convention => roll shift = -d)
        return jnp.where(mask, pltpu.roll(src, (-d) % HWp, axis=1), neg)

    # pool along W (within each row); balanced max tree + center
    r = jnp.maximum(
        jnp.maximum(tap(a, -2, w_masks[0]), tap(a, -1, w_masks[1])),
        jnp.maximum(tap(a, 1, w_masks[2]), tap(a, 2, w_masks[3])))
    r = jnp.maximum(r, a)
    # pool along H (shifts are multiples of W in the flat layout)
    out = jnp.maximum(
        jnp.maximum(tap(r, -2 * W, h_masks[0]), tap(r, -W, h_masks[1])),
        jnp.maximum(tap(r, W, h_masks[2]), tap(r, 2 * W, h_masks[3])))
    return jnp.maximum(out, r)


def sppf_kernel(x_ref, w1_ref, b1_ref, w2s_ref, b2_ref, o_ref, *, H, W, approx_silu):
    # x_ref:   (nb, Cin, HWp)   w1: (Ch, Cin)   b1: (Ch, 1)
    # w2s_ref: (4, Coutb, Ch)   b2: (Coutb, 1)  o_ref: (nb, Coutb, HWp)
    nb = x_ref.shape[0]
    cdt = x_ref.dtype

    w1 = w1_ref[...]
    b1 = b1_ref[...].astype(jnp.float32)
    b2 = b2_ref[...].astype(jnp.float32)

    # masks built once per grid step, shared by every batch element / pool
    w_masks, h_masks = _pool_masks(x_ref.shape[-1], H, W)

    for n in range(nb):
        x = x_ref[n]                                                  # (Cin, HWp)
        # cv1: 1x1 conv (BN folded) + SiLU
        y = _silu(_matmul_1x1(w1, x) + b1, approx_silu).astype(cdt)   # (Ch, HWp)

        # cv2 interleaved with the pool cascade: no channel concat ever exists,
        # live set stays {y, acc}, MXU dots overlap with XLU/VALU pool work.
        acc = b2 + _matmul_1x1(w2s_ref[0], y)                         # (Coutb, HWp) f32
        for k in range(1, 4):
            y = _maxpool5_flat(y, w_masks, h_masks, W)
            acc = acc + _matmul_1x1(w2s_ref[k], y)

        # single full-block, lane-dense (multiple of 128) store per batch element
        o_ref[n] = _silu(acc, approx_silu).astype(o_ref.dtype)


def sppf_pallas(x, w1, b1, w2, b2, *, fast=True, batch_block=None, cout_blocks=1):
    """SPPF forward.

    fast=True  : bf16 activations/weights, f32 accumulation, EUP approx SiLU.
    fast=False : f32 end-to-end, exact sigmoid (reference-precision path).
    batch_block: batch elements per grid step (None = auto; folds the whole
                 batch into one step at tiny shapes to amortize step overhead).
    cout_blocks: split Cout into this many 'parallel' grid blocks so both v7x
                 TensorCores get work at batch 1 (Cout // cout_blocks % 8 == 0).
    """
    N, Cin, H, W = x.shape
    Ch = w1.shape[0]
    Cout = w2.shape[0]
    HW = H * W
    HWp = ((HW + 127) // 128) * 128     # lane-dense, unmasked stores

    cdt = jnp.bfloat16 if fast else jnp.float32
    in_isz = jnp.dtype(cdt).itemsize
    out_isz = jnp.dtype(x.dtype).itemsize

    if batch_block is None:
        nb = N if N * max(Cin, Cout) * HWp * in_isz <= (2 << 20) else 1
    else:
        nb = batch_block
    assert N % nb == 0, "batch_block must divide N"

    assert Cout % cout_blocks == 0, "cout_blocks must divide out_ch"
    cout_blk = Cout // cout_blocks
    assert cout_blocks == 1 or cout_blk % 8 == 0, \
        "Cout // cout_blocks must be a multiple of 8 (sublane tiling)"

    # lane-dense layout in HBM (free reshapes); pad H*W to a multiple of 128;
    # pre-split w2 into its 4 branch blocks so the channel concat never exists.
    x_flat = x.reshape(N, Cin, HW)
    if HWp != HW:
        x_flat = jnp.pad(x_flat, ((0, 0), (0, 0), (0, HWp - HW)))
    x_flat = x_flat.astype(cdt)
    w1c = w1.astype(cdt)
    b1c = b1.astype(jnp.float32)
    w2s = w2.reshape(Cout, 4, Ch).transpose(1, 0, 2).astype(cdt)   # (4, Cout, Ch)
    b2c = b2.astype(jnp.float32)

    grid = (N // nb, cout_blocks)

    # rough VMEM budget: double-buffered I/O blocks + weights + live intermediates;
    # explicit limit keeps us inside v7x's 64 MiB physical VMEM.
    vmem_bytes = (2 * nb * Cin * HWp * in_isz
                  + 2 * nb * cout_blk * HWp * out_isz
                  + (Ch * Cin + 4 * cout_blk * Ch) * in_isz
                  + (2 * Ch + 2 * cout_blk) * HWp * 4)
    vmem_limit = int(min(max(2 * vmem_bytes, 4 << 20), 48 << 20))

    flops = N * (2 * Ch * Cin * HWp + 2 * Cout * 4 * Ch * HWp + 3 * 9 * Ch * HWp)
    transcendentals = N * (Ch + Cout) * HWp
    bytes_accessed = (N * Cin * HWp * in_isz + N * Cout * HWp * out_isz
                      + cout_blocks * (Ch * Cin + 4 * Cout * Ch) * in_isz
                      + 4 * (Ch + Cout))

    out_flat = pl.pallas_call(
        functools.partial(sppf_kernel, H=H, W=W, approx_silu=fast),
        out_shape=jax.ShapeDtypeStruct((N, Cout, HWp), x.dtype),
        grid=grid,
        in_specs=[
            pl.BlockSpec((nb, Cin, HWp), lambda n, j: (n, 0, 0)),
            pl.BlockSpec((Ch, Cin), lambda n, j: (0, 0)),
            pl.BlockSpec((Ch, 1), lambda n, j: (0, 0)),
            pl.BlockSpec((4, cout_blk, Ch), lambda n, j: (0, j, 0)),
            pl.BlockSpec((cout_blk, 1), lambda n, j: (j, 0)),
        ],
        out_specs=pl.BlockSpec((nb, cout_blk, HWp), lambda n, j: (n, j, 0)),
        compiler_params=pltpu.CompilerParams(
            dimension_semantics=("parallel", "parallel"),
            vmem_limit_bytes=vmem_limit),
        cost_estimate=pl.CostEstimate(
            flops=int(flops),
            transcendentals=int(transcendentals),
            bytes_accessed=int(bytes_accessed)),
    )(x_flat, w1c, b1c, w2s, b2c)

    if HWp != HW:
        out_flat = out_flat[:, :, :HW]
    return out_flat.reshape(N, Cout, H, W)


# ---------------- pure-JAX reference (for correctness check) ----------------
def _silu_ref(x):
    return x * jax.nn.sigmoid(x)


def sppf_ref(x, w1, b1, w2, b2):
    hp = lax.Precision.HIGHEST
    y1 = _silu_ref(jnp.einsum('oc,nchw->nohw', w1, x, precision=hp)
                   + b1.reshape(1, -1, 1, 1))

    def pool(a):
        return lax.reduce_window(a, -jnp.inf, lax.max,
                                 (1, 1, 5, 5), (1, 1, 1, 1),
                                 ((0, 0), (0, 0), (2, 2), (2, 2)))

    y2 = pool(y1)
    y3 = pool(y2)
    y4 = pool(y3)
    ycat = jnp.concatenate([y1, y2, y3, y4], axis=1)
    return _silu_ref(jnp.einsum('oc,nchw->nohw', w2, ycat, precision=hp)
                     + b2.reshape(1, -1, 1, 1))


if __name__ == "__main__":
    # small shapes consistent with SPPF(in_ch=4, out_ch=8, k=5)
    N, in_ch, out_ch, H, W = 2, 4, 8, 16, 16
    hidden = in_ch // 2            # cv1: in_ch -> hidden;  cv2: 4*hidden -> out_ch

    key = jax.random.PRNGKey(0)
    (kx, kx2, k1, k2,
     kg1, kb1, km1, kv1,
     kg2, kb2, km2, kv2) = jax.random.split(key, 12)
    x = jax.random.normal(kx, (N, in_ch, H, W), dtype=jnp.float32)

    # raw 1x1 conv weights (bias-free, like YOLOv5 Conv)
    w1_raw = 0.5 * jax.random.normal(k1, (hidden, in_ch), dtype=jnp.float32)
    w2_raw = 0.5 * jax.random.normal(k2, (out_ch, 4 * hidden), dtype=jnp.float32)

    # fold eval-mode BatchNorm (eps=1e-3) with non-trivial stats into w/b
    eps = 1e-3

    def fold_bn(w_raw, kg, kb, km, kv):
        c = w_raw.shape[0]
        gamma = 1.0 + 0.1 * jax.random.normal(kg, (c,), dtype=jnp.float32)
        beta = 0.1 * jax.random.normal(kb, (c,), dtype=jnp.float32)
        mean = 0.1 * jax.random.normal(km, (c,), dtype=jnp.float32)
        var = jax.random.uniform(kv, (c,), jnp.float32, 0.5, 1.5)
        scale = gamma / jnp.sqrt(var + eps)
        return w_raw * scale[:, None], (beta - scale * mean).reshape(c, 1)

    w1, b1 = fold_bn(w1_raw, kg1, kb1, km1, kv1)
    w2, b2 = fold_bn(w2_raw, kg2, kb2, km2, kv2)

    ref = sppf_ref(x, w1, b1, w2, b2)

    # 1) precise path (f32 end-to-end, exact sigmoid): strict check
    out = jax.block_until_ready(
        jax.jit(functools.partial(sppf_pallas, fast=False))(x, w1, b1, w2, b2))
    assert out.shape == (N, out_ch, H, W)
    err = float(jnp.max(jnp.abs(out - ref)))
    assert err < 5e-4, f"precise path mismatch vs JAX reference: {err}"

    # 2) fast path (bf16 storage, f32 accumulation, EUP approx SiLU): loose check
    out_fast = jax.block_until_ready(
        jax.jit(functools.partial(sppf_pallas, fast=True))(x, w1, b1, w2, b2))
    err_fast = float(jnp.max(jnp.abs(out_fast - ref)))
    assert err_fast < 2e-1, f"fast (bf16) path mismatch vs JAX reference: {err_fast}"

    # 3) non-multiple-of-128 spatial map (10x10 -> padded to 128 lanes): strict check
    x2 = jax.random.normal(kx2, (1, in_ch, 10, 10), dtype=jnp.float32)
    out2 = jax.block_until_ready(
        jax.jit(functools.partial(sppf_pallas, fast=False))(x2, w1, b1, w2, b2))
    ref2 = sppf_ref(x2, w1, b1, w2, b2)
    err2 = float(jnp.max(jnp.abs(out2 - ref2)))
    assert err2 < 5e-4, f"padded-lane path mismatch vs JAX reference: {err2}"

    print("KERNEL_OK")
</pallas_src>

<mosaic_0001>
module attributes {stable_mosaic.version = 11 : i64} {
  func.func @sppf_kernel(%arg0: i32, %arg1: i32, %arg2: memref<2x4x256xf32, #tpu.memory_space<vmem>>, %arg3: memref<2x4xf32, #tpu.memory_space<vmem>>, %arg4: memref<2x1xf32, #tpu.memory_space<vmem>>, %arg5: memref<4x8x2xf32, #tpu.memory_space<vmem>>, %arg6: memref<8x1xf32, #tpu.memory_space<vmem>>, %arg7: memref<2x8x256xf32, #tpu.memory_space<vmem>>) attributes {dimension_semantics = [#tpu.dimension_semantics<parallel>, #tpu.dimension_semantics<parallel>], iteration_bounds = array<i64: 1, 1>, scalar_prefetch = 0 : i64, scratch_operands = 0 : i64, tpu.core_type = #tpu.core_type<tc>, window_params = [{transform_indices = @transform_0, window_bounds = array<i64: 2, 4, 256>}, {pipeline_mode = #tpu.pipeline_mode<synchronous>, transform_indices = @transform_1, window_bounds = array<i64: 2, 4>}, {pipeline_mode = #tpu.pipeline_mode<synchronous>, transform_indices = @transform_2, window_bounds = array<i64: 2, 1>}, {transform_indices = @transform_3, window_bounds = array<i64: 4, 8, 2>}, {transform_indices = @transform_4, window_bounds = array<i64: 8, 1>}, {transform_indices = @transform_5, window_bounds = array<i64: 2, 8, 256>}]} {
    %c0 = arith.constant 0 : index
    %c0_0 = arith.constant 0 : index
    %0 = vector.load %arg3[%c0, %c0_0] : memref<2x4xf32, #tpu.memory_space<vmem>>, vector<2x4xf32>
    %c0_1 = arith.constant 0 : index
    %c0_2 = arith.constant 0 : index
    %1 = vector.load %arg4[%c0_1, %c0_2] : memref<2x1xf32, #tpu.memory_space<vmem>>, vector<2x1xf32>
    %c0_3 = arith.constant 0 : index
    %c0_4 = arith.constant 0 : index
    %2 = vector.load %arg6[%c0_3, %c0_4] : memref<8x1xf32, #tpu.memory_space<vmem>>, vector<8x1xf32>
    %3 = tpu.iota {dimensions = array<i32: 1>} : vector<1x256xi32>
    %c15_i32 = arith.constant 15 : i32
    %4 = vector.broadcast %c15_i32 : i32 to vector<1x256xi32>
    %5 = arith.andi %3, %4 : vector<1x256xi32>
    %c2_i32 = arith.constant 2 : i32
    %6 = vector.broadcast %c2_i32 : i32 to vector<1x256xi32>
    %7 = arith.cmpi sge, %5, %6 : vector<1x256xi32>
    %c1_i32 = arith.constant 1 : i32
    %8 = vector.broadcast %c1_i32 : i32 to vector<1x256xi32>
    %9 = arith.cmpi sge, %5, %8 : vector<1x256xi32>
    %c15_i32_5 = arith.constant 15 : i32
    %10 = vector.broadcast %c15_i32_5 : i32 to vector<1x256xi32>
    %11 = arith.cmpi slt, %5, %10 : vector<1x256xi32>
    %c14_i32 = arith.constant 14 : i32
    %12 = vector.broadcast %c14_i32 : i32 to vector<1x256xi32>
    %13 = arith.cmpi slt, %5, %12 : vector<1x256xi32>
    %c32_i32 = arith.constant 32 : i32
    %14 = vector.broadcast %c32_i32 : i32 to vector<1x256xi32>
    %15 = arith.cmpi sge, %3, %14 : vector<1x256xi32>
    %c16_i32 = arith.constant 16 : i32
    %16 = vector.broadcast %c16_i32 : i32 to vector<1x256xi32>
    %17 = arith.cmpi sge, %3, %16 : vector<1x256xi32>
    %c240_i32 = arith.constant 240 : i32
    %18 = vector.broadcast %c240_i32 : i32 to vector<1x256xi32>
    %19 = arith.cmpi slt, %3, %18 : vector<1x256xi32>
    %c224_i32 = arith.constant 224 : i32
    %20 = vector.broadcast %c224_i32 : i32 to vector<1x256xi32>
    %21 = arith.cmpi slt, %3, %20 : vector<1x256xi32>
    %c0_6 = arith.constant 0 : index
    %c0_7 = arith.constant 0 : index
    %c0_8 = arith.constant 0 : index
    %22 = vector.load %arg2[%c0_6, %c0_7, %c0_8] : memref<2x4x256xf32, #tpu.memory_space<vmem>>, vector<1x4x256xf32>
    %23 = vector.shape_cast %22 : vector<1x4x256xf32> to vector<4x256xf32>
    %24 = vector.extract_strided_slice %0 {offsets = [0, 0], sizes = [2, 1], strides = [1, 1]} : vector<2x4xf32> to vector<2x1xf32>
    %25 = vector.extract_strided_slice %23 {offsets = [0, 0], sizes = [1, 256], strides = [1, 1]} : vector<4x256xf32> to vector<1x256xf32>
    %26 = vector.broadcast %24 : vector<2x1xf32> to vector<2x256xf32>
    %27 = vector.broadcast %25 : vector<1x256xf32> to vector<2x256xf32>
    %28 = arith.mulf %26, %27 : vector<2x256xf32>
    %29 = vector.extract_strided_slice %0 {offsets = [0, 1], sizes = [2, 1], strides = [1, 1]} : vector<2x4xf32> to vector<2x1xf32>
    %30 = vector.extract_strided_slice %23 {offsets = [1, 0], sizes = [1, 256], strides = [1, 1]} : vector<4x256xf32> to vector<1x256xf32>
    %31 = vector.broadcast %29 : vector<2x1xf32> to vector<2x256xf32>
    %32 = vector.broadcast %30 : vector<1x256xf32> to vector<2x256xf32>
    %33 = arith.mulf %31, %32 : vector<2x256xf32>
    %34 = arith.addf %28, %33 : vector<2x256xf32>
    %35 = vector.extract_strided_slice %0 {offsets = [0, 2], sizes = [2, 1], strides = [1, 1]} : vector<2x4xf32> to vector<2x1xf32>
    %36 = vector.extract_strided_slice %23 {offsets = [2, 0], sizes = [1, 256], strides = [1, 1]} : vector<4x256xf32> to vector<1x256xf32>
    %37 = vector.broadcast %35 : vector<2x1xf32> to vector<2x256xf32>
    %38 = vector.broadcast %36 : vector<1x256xf32> to vector<2x256xf32>
    %39 = arith.mulf %37, %38 : vector<2x256xf32>
    %40 = arith.addf %34, %39 : vector<2x256xf32>
    %41 = vector.extract_strided_slice %0 {offsets = [0, 3], sizes = [2, 1], strides = [1, 1]} : vector<2x4xf32> to vector<2x1xf32>
    %42 = vector.extract_strided_slice %23 {offsets = [3, 0], sizes = [1, 256], strides = [1, 1]} : vector<4x256xf32> to vector<1x256xf32>
    %43 = vector.broadcast %41 : vector<2x1xf32> to vector<2x256xf32>
    %44 = vector.broadcast %42 : vector<1x256xf32> to vector<2x256xf32>
    %45 = arith.mulf %43, %44 : vector<2x256xf32>
    %46 = arith.addf %40, %45 : vector<2x256xf32>
    %47 = vector.broadcast %1 : vector<2x1xf32> to vector<2x256xf32>
    %48 = arith.addf %46, %47 : vector<2x256xf32>
    %49 = arith.negf %48 : vector<2x256xf32>
    %50 = math.exp %49 : vector<2x256xf32>
    %cst = arith.constant 1.000000e+00 : f32
    %51 = vector.broadcast %cst : f32 to vector<2x256xf32>
    %52 = arith.addf %51, %50 : vector<2x256xf32>
    %53 = arith.divf %51, %52 : vector<2x256xf32>
    %54 = arith.mulf %48, %53 : vector<2x256xf32>
    %c0_9 = arith.constant 0 : index
    %c0_10 = arith.constant 0 : index
    %c0_11 = arith.constant 0 : index
    %55 = vector.load %arg5[%c0_9, %c0_10, %c0_11] : memref<4x8x2xf32, #tpu.memory_space<vmem>>, vector<1x8x2xf32>
    %56 = vector.shape_cast %55 : vector<1x8x2xf32> to vector<8x2xf32>
    %57 = vector.extract_strided_slice %56 {offsets = [0, 0], sizes = [8, 1], strides = [1, 1]} : vector<8x2xf32> to vector<8x1xf32>
    %58 = vector.extract_strided_slice %54 {offsets = [0, 0], sizes = [1, 256], strides = [1, 1]} : vector<2x256xf32> to vector<1x256xf32>
    %59 = vector.broadcast %57 : vector<8x1xf32> to vector<8x256xf32>
    %60 = vector.broadcast %58 : vector<1x256xf32> to vector<8x256xf32>
    %61 = arith.mulf %59, %60 : vector<8x256xf32>
    %62 = vector.extract_strided_slice %56 {offsets = [0, 1], sizes = [8, 1], strides = [1, 1]} : vector<8x2xf32> to vector<8x1xf32>
    %63 = vector.extract_strided_slice %54 {offsets = [1, 0], sizes = [1, 256], strides = [1, 1]} : vector<2x256xf32> to vector<1x256xf32>
    %64 = vector.broadcast %62 : vector<8x1xf32> to vector<8x256xf32>
    %65 = vector.broadcast %63 : vector<1x256xf32> to vector<8x256xf32>
    %66 = arith.mulf %64, %65 : vector<8x256xf32>
    %67 = arith.addf %61, %66 : vector<8x256xf32>
    %68 = vector.broadcast %2 : vector<8x1xf32> to vector<8x256xf32>
    %69 = arith.addf %68, %67 : vector<8x256xf32>
    %c2_i32_12 = arith.constant 2 : i32
    %70 = tpu.dynamic_rotate %54 by %c2_i32_12 dim 1 : vector<2x256xf32>, i32 -> vector<2x256xf32>
    %cst_13 = arith.constant 0xFF800000 : f32
    %71 = vector.shape_cast %7 : vector<1x256xi1> to vector<1x256xi1>
    %72 = vector.broadcast %71 : vector<1x256xi1> to vector<2x256xi1>
    %73 = vector.broadcast %cst_13 : f32 to vector<2x256xf32>
    %74 = arith.select %72, %70, %73 : vector<2x256xi1>, vector<2x256xf32>
    %c1_i32_14 = arith.constant 1 : i32
    %75 = tpu.dynamic_rotate %54 by %c1_i32_14 dim 1 : vector<2x256xf32>, i32 -> vector<2x256xf32>
    %cst_15 = arith.constant 0xFF800000 : f32
    %76 = vector.shape_cast %9 : vector<1x256xi1> to vector<1x256xi1>
    %77 = vector.broadcast %76 : vector<1x256xi1> to vector<2x256xi1>
    %78 = vector.broadcast %cst_15 : f32 to vector<2x256xf32>
    %79 = arith.select %77, %75, %78 : vector<2x256xi1>, vector<2x256xf32>
    %80 = arith.maximumf %74, %79 : vector<2x256xf32>
    %c255_i32 = arith.constant 255 : i32
    %81 = tpu.dynamic_rotate %54 by %c255_i32 dim 1 : vector<2x256xf32>, i32 -> vector<2x256xf32>
    %cst_16 = arith.constant 0xFF800000 : f32
    %82 = vector.shape_cast %11 : vector<1x256xi1> to vector<1x256xi1>
    %83 = vector.broadcast %82 : vector<1x256xi1> to vector<2x256xi1>
    %84 = vector.broadcast %cst_16 : f32 to vector<2x256xf32>
    %85 = arith.select %83, %81, %84 : vector<2x256xi1>, vector<2x256xf32>
    %c254_i32 = arith.constant 254 : i32
    %86 = tpu.dynamic_rotate %54 by %c254_i32 dim 1 : vector<2x256xf32>, i32 -> vector<2x256xf32>
    %cst_17 = arith.constant 0xFF800000 : f32
    %87 = vector.shape_cast %13 : vector<1x256xi1> to vector<1x256xi1>
    %88 = vector.broadcast %87 : vector<1x256xi1> to vector<2x256xi1>
    %89 = vector.broadcast %cst_17 : f32 to vector<2x256xf32>
    %90 = arith.select %88, %86, %89 : vector<2x256xi1>, vector<2x256xf32>
    %91 = arith.maximumf %85, %90 : vector<2x256xf32>
    %92 = arith.maximumf %80, %91 : vector<2x256xf32>
    %93 = arith.maximumf %92, %54 : vector<2x256xf32>
    %c32_i32_18 = arith.constant 32 : i32
    %94 = tpu.dynamic_rotate %93 by %c32_i32_18 dim 1 : vector<2x256xf32>, i32 -> vector<2x256xf32>
    %cst_19 = arith.constant 0xFF800000 : f32
    %95 = vector.shape_cast %15 : vector<1x256xi1> to vector<1x256xi1>
    %96 = vector.broadcast %95 : vector<1x256xi1> to vector<2x256xi1>
    %97 = vector.broadcast %cst_19 : f32 to vector<2x256xf32>
    %98 = arith.select %96, %94, %97 : vector<2x256xi1>, vector<2x256xf32>
    %c16_i32_20 = arith.constant 16 : i32
    %99 = tpu.dynamic_rotate %93 by %c16_i32_20 dim 1 : vector<2x256xf32>, i32 -> vector<2x256xf32>
    %cst_21 = arith.constant 0xFF800000 : f32
    %100 = vector.shape_cast %17 : vector<1x256xi1> to vector<1x256xi1>
    %101 = vector.broadcast %100 : vector<1x256xi1> to vector<2x256xi1>
    %102 = vector.broadcast %cst_21 : f32 to vector<2x256xf32>
    %103 = arith.select %101, %99, %102 : vector<2x256xi1>, vector<2x256xf32>
    %104 = arith.maximumf %98, %103 : vector<2x256xf32>
    %c240_i32_22 = arith.constant 240 : i32
    %105 = tpu.dynamic_rotate %93 by %c240_i32_22 dim 1 : vector<2x256xf32>, i32 -> vector<2x256xf32>
    %cst_23 = arith.constant 0xFF800000 : f32
    %106 = vector.shape_cast %19 : vector<1x256xi1> to vector<1x256xi1>
    %107 = vector.broadcast %106 : vector<1x256xi1> to vector<2x256xi1>
    %108 = vector.broadcast %cst_23 : f32 to vector<2x256xf32>
    %109 = arith.select %107, %105, %108 : vector<2x256xi1>, vector<2x256xf32>
    %c224_i32_24 = arith.constant 224 : i32
    %110 = tpu.dynamic_rotate %93 by %c224_i32_24 dim 1 : vector<2x256xf32>, i32 -> vector<2x256xf32>
    %cst_25 = arith.constant 0xFF800000 : f32
    %111 = vector.shape_cast %21 : vector<1x256xi1> to vector<1x256xi1>
    %112 = vector.broadcast %111 : vector<1x256xi1> to vector<2x256xi1>
    %113 = vector.broadcast %cst_25 : f32 to vector<2x256xf32>
    %114 = arith.select %112, %110, %113 : vector<2x256xi1>, vector<2x256xf32>
    %115 = arith.maximumf %109, %114 : vector<2x256xf32>
    %116 = arith.maximumf %104, %115 : vector<2x256xf32>
    %117 = arith.maximumf %116, %93 : vector<2x256xf32>
    %c1 = arith.constant 1 : index
    %c0_26 = arith.constant 0 : index
    %c0_27 = arith.constant 0 : index
    %118 = vector.load %arg5[%c1, %c0_26, %c0_27] : memref<4x8x2xf32, #tpu.memory_space<vmem>>, vector<1x8x2xf32>
    %119 = vector.shape_cast %118 : vector<1x8x2xf32> to vector<8x2xf32>
    %120 = vector.extract_strided_slice %119 {offsets = [0, 0], sizes = [8, 1], strides = [1, 1]} : vector<8x2xf32> to vector<8x1xf32>
    %121 = vector.extract_strided_slice %117 {offsets = [0, 0], sizes = [1, 256], strides = [1, 1]} : vector<2x256xf32> to vector<1x256xf32>
    %122 = vector.broadcast %120 : vector<8x1xf32> to vector<8x256xf32>
    %123 = vector.broadcast %121 : vector<1x256xf32> to vector<8x256xf32>
    %124 = arith.mulf %122, %123 : vector<8x256xf32>
    %125 = vector.extract_strided_slice %119 {offsets = [0, 1], sizes = [8, 1], strides = [1, 1]} : vector<8x2xf32> to vector<8x1xf32>
    %126 = vector.extract_strided_slice %117 {offsets = [1, 0], sizes = [1, 256], strides = [1, 1]} : vector<2x256xf32> to vector<1x256xf32>
    %127 = vector.broadcast %125 : vector<8x1xf32> to vector<8x256xf32>
    %128 = vector.broadcast %126 : vector<1x256xf32> to vector<8x256xf32>
    %129 = arith.mulf %127, %128 : vector<8x256xf32>
    %130 = arith.addf %124, %129 : vector<8x256xf32>
    %131 = arith.addf %69, %130 : vector<8x256xf32>
    %c2_i32_28 = arith.constant 2 : i32
    %132 = tpu.dynamic_rotate %117 by %c2_i32_28 dim 1 : vector<2x256xf32>, i32 -> vector<2x256xf32>
    %cst_29 = arith.constant 0xFF800000 : f32
    %133 = vector.shape_cast %7 : vector<1x256xi1> to vector<1x256xi1>
    %134 = vector.broadcast %133 : vector<1x256xi1> to vector<2x256xi1>
    %135 = vector.broadcast %cst_29 : f32 to vector<2x256xf32>
    %136 = arith.select %134, %132, %135 : vector<2x256xi1>, vector<2x256xf32>
    %c1_i32_30 = arith.constant 1 : i32
    %137 = tpu.dynamic_rotate %117 by %c1_i32_30 dim 1 : vector<2x256xf32>, i32 -> vector<2x256xf32>
    %cst_31 = arith.constant 0xFF800000 : f32
    %138 = vector.shape_cast %9 : vector<1x256xi1> to vector<1x256xi1>
    %139 = vector.broadcast %138 : vector<1x256xi1> to vector<2x256xi1>
    %140 = vector.broadcast %cst_31 : f32 to vector<2x256xf32>
    %141 = arith.select %139, %137, %140 : vector<2x256xi1>, vector<2x256xf32>
    %142 = arith.maximumf %136, %141 : vector<2x256xf32>
    %c255_i32_32 = arith.constant 255 : i32
    %143 = tpu.dynamic_rotate %117 by %c255_i32_32 dim 1 : vector<2x256xf32>, i32 -> vector<2x256xf32>
    %cst_33 = arith.constant 0xFF800000 : f32
    %144 = vector.shape_cast %11 : vector<1x256xi1> to vector<1x256xi1>
    %145 = vector.broadcast %144 : vector<1x256xi1> to vector<2x256xi1>
    %146 = vector.broadcast %cst_33 : f32 to vector<2x256xf32>
    %147 = arith.select %145, %143, %146 : vector<2x256xi1>, vector<2x256xf32>
    %c254_i32_34 = arith.constant 254 : i32
    %148 = tpu.dynamic_rotate %117 by %c254_i32_34 dim 1 : vector<2x256xf32>, i32 -> vector<2x256xf32>
    %cst_35 = arith.constant 0xFF800000 : f32
    %149 = vector.shape_cast %13 : vector<1x256xi1> to vector<1x256xi1>
    %150 = vector.broadcast %149 : vector<1x256xi1> to vector<2x256xi1>
    %151 = vector.broadcast %cst_35 : f32 to vector<2x256xf32>
    %152 = arith.select %150, %148, %151 : vector<2x256xi1>, vector<2x256xf32>
    %153 = arith.maximumf %147, %152 : vector<2x256xf32>
    %154 = arith.maximumf %142, %153 : vector<2x256xf32>
    %155 = arith.maximumf %154, %117 : vector<2x256xf32>
    %c32_i32_36 = arith.constant 32 : i32
    %156 = tpu.dynamic_rotate %155 by %c32_i32_36 dim 1 : vector<2x256xf32>, i32 -> vector<2x256xf32>
    %cst_37 = arith.constant 0xFF800000 : f32
    %157 = vector.shape_cast %15 : vector<1x256xi1> to vector<1x256xi1>
    %158 = vector.broadcast %157 : vector<1x256xi1> to vector<2x256xi1>
    %159 = vector.broadcast %cst_37 : f32 to vector<2x256xf32>
    %160 = arith.select %158, %156, %159 : vector<2x256xi1>, vector<2x256xf32>
    %c16_i32_38 = arith.constant 16 : i32
    %161 = tpu.dynamic_rotate %155 by %c16_i32_38 dim 1 : vector<2x256xf32>, i32 -> vector<2x256xf32>
    %cst_39 = arith.constant 0xFF800000 : f32
    %162 = vector.shape_cast %17 : vector<1x256xi1> to vector<1x256xi1>
    %163 = vector.broadcast %162 : vector<1x256xi1> to vector<2x256xi1>
    %164 = vector.broadcast %cst_39 : f32 to vector<2x256xf32>
    %165 = arith.select %163, %161, %164 : vector<2x256xi1>, vector<2x256xf32>
    %166 = arith.maximumf %160, %165 : vector<2x256xf32>
    %c240_i32_40 = arith.constant 240 : i32
    %167 = tpu.dynamic_rotate %155 by %c240_i32_40 dim 1 : vector<2x256xf32>, i32 -> vector<2x256xf32>
    %cst_41 = arith.constant 0xFF800000 : f32
    %168 = vector.shape_cast %19 : vector<1x256xi1> to vector<1x256xi1>
    %169 = vector.broadcast %168 : vector<1x256xi1> to vector<2x256xi1>
    %170 = vector.broadcast %cst_41 : f32 to vector<2x256xf32>
    %171 = arith.select %169, %167, %170 : vector<2x256xi1>, vector<2x256xf32>
    %c224_i32_42 = arith.constant 224 : i32
    %172 = tpu.dynamic_rotate %155 by %c224_i32_42 dim 1 : vector<2x256xf32>, i32 -> vector<2x256xf32>
    %cst_43 = arith.constant 0xFF800000 : f32
    %173 = vector.shape_cast %21 : vector<1x256xi1> to vector<1x256xi1>
    %174 = vector.broadcast %173 : vector<1x256xi1> to vector<2x256xi1>
    %175 = vector.broadcast %cst_43 : f32 to vector<2x256xf32>
    %176 = arith.select %174, %172, %175 : vector<2x256xi1>, vector<2x256xf32>
    %177 = arith.maximumf %171, %176 : vector<2x256xf32>
    %178 = arith.maximumf %166, %177 : vector<2x256xf32>
    %179 = arith.maximumf %178, %155 : vector<2x256xf32>
    %c2 = arith.constant 2 : index
    %c0_44 = arith.constant 0 : index
    %c0_45 = arith.constant 0 : index
    %180 = vector.load %arg5[%c2, %c0_44, %c0_45] : memref<4x8x2xf32, #tpu.memory_space<vmem>>, vector<1x8x2xf32>
    %181 = vector.shape_cast %180 : vector<1x8x2xf32> to vector<8x2xf32>
    %182 = vector.extract_strided_slice %181 {offsets = [0, 0], sizes = [8, 1], strides = [1, 1]} : vector<8x2xf32> to vector<8x1xf32>
    %183 = vector.extract_strided_slice %179 {offsets = [0, 0], sizes = [1, 256], strides = [1, 1]} : vector<2x256xf32> to vector<1x256xf32>
    %184 = vector.broadcast %182 : vector<8x1xf32> to vector<8x256xf32>
    %185 = vector.broadcast %183 : vector<1x256xf32> to vector<8x256xf32>
    %186 = arith.mulf %184, %185 : vector<8x256xf32>
    %187 = vector.extract_strided_slice %181 {offsets = [0, 1], sizes = [8, 1], strides = [1, 1]} : vector<8x2xf32> to vector<8x1xf32>
    %188 = vector.extract_strided_slice %179 {offsets = [1, 0], sizes = [1, 256], strides = [1, 1]} : vector<2x256xf32> to vector<1x256xf32>
    %189 = vector.broadcast %187 : vector<8x1xf32> to vector<8x256xf32>
    %190 = vector.broadcast %188 : vector<1x256xf32> to vector<8x256xf32>
    %191 = arith.mulf %189, %190 : vector<8x256xf32>
    %192 = arith.addf %186, %191 : vector<8x256xf32>
    %193 = arith.addf %131, %192 : vector<8x256xf32>
    %c2_i32_46 = arith.constant 2 : i32
    %194 = tpu.dynamic_rotate %179 by %c2_i32_46 dim 1 : vector<2x256xf32>, i32 -> vector<2x256xf32>
    %cst_47 = arith.constant 0xFF800000 : f32
    %195 = vector.shape_cast %7 : vector<1x256xi1> to vector<1x256xi1>
    %196 = vector.broadcast %195 : vector<1x256xi1> to vector<2x256xi1>
    %197 = vector.broadcast %cst_47 : f32 to vector<2x256xf32>
    %198 = arith.select %196, %194, %197 : vector<2x256xi1>, vector<2x256xf32>
    %c1_i32_48 = arith.constant 1 : i32
    %199 = tpu.dynamic_rotate %179 by %c1_i32_48 dim 1 : vector<2x256xf32>, i32 -> vector<2x256xf32>
    %cst_49 = arith.constant 0xFF800000 : f32
    %200 = vector.shape_cast %9 : vector<1x256xi1> to vector<1x256xi1>
    %201 = vector.broadcast %200 : vector<1x256xi1> to vector<2x256xi1>
    %202 = vector.broadcast %cst_49 : f32 to vector<2x256xf32>
    %203 = arith.select %201, %199, %202 : vector<2x256xi1>, vector<2x256xf32>
    %204 = arith.maximumf %198, %203 : vector<2x256xf32>
    %c255_i32_50 = arith.constant 255 : i32
    %205 = tpu.dynamic_rotate %179 by %c255_i32_50 dim 1 : vector<2x256xf32>, i32 -> vector<2x256xf32>
    %cst_51 = arith.constant 0xFF800000 : f32
    %206 = vector.shape_cast %11 : vector<1x256xi1> to vector<1x256xi1>
    %207 = vector.broadcast %206 : vector<1x256xi1> to vector<2x256xi1>
    %208 = vector.broadcast %cst_51 : f32 to vector<2x256xf32>
    %209 = arith.select %207, %205, %208 : vector<2x256xi1>, vector<2x256xf32>
    %c254_i32_52 = arith.constant 254 : i32
    %210 = tpu.dynamic_rotate %179 by %c254_i32_52 dim 1 : vector<2x256xf32>, i32 -> vector<2x256xf32>
    %cst_53 = arith.constant 0xFF800000 : f32
    %211 = vector.shape_cast %13 : vector<1x256xi1> to vector<1x256xi1>
    %212 = vector.broadcast %211 : vector<1x256xi1> to vector<2x256xi1>
    %213 = vector.broadcast %cst_53 : f32 to vector<2x256xf32>
    %214 = arith.select %212, %210, %213 : vector<2x256xi1>, vector<2x256xf32>
    %215 = arith.maximumf %209, %214 : vector<2x256xf32>
    %216 = arith.maximumf %204, %215 : vector<2x256xf32>
    %217 = arith.maximumf %216, %179 : vector<2x256xf32>
    %c32_i32_54 = arith.constant 32 : i32
    %218 = tpu.dynamic_rotate %217 by %c32_i32_54 dim 1 : vector<2x256xf32>, i32 -> vector<2x256xf32>
    %cst_55 = arith.constant 0xFF800000 : f32
    %219 = vector.shape_cast %15 : vector<1x256xi1> to vector<1x256xi1>
    %220 = vector.broadcast %219 : vector<1x256xi1> to vector<2x256xi1>
    %221 = vector.broadcast %cst_55 : f32 to vector<2x256xf32>
    %222 = arith.select %220, %218, %221 : vector<2x256xi1>, vector<2x256xf32>
    %c16_i32_56 = arith.constant 16 : i32
    %223 = tpu.dynamic_rotate %217 by %c16_i32_56 dim 1 : vector<2x256xf32>, i32 -> vector<2x256xf32>
    %cst_57 = arith.constant 0xFF800000 : f32
    %224 = vector.shape_cast %17 : vector<1x256xi1> to vector<1x256xi1>
    %225 = vector.broadcast %224 : vector<1x256xi1> to vector<2x256xi1>
    %226 = vector.broadcast %cst_57 : f32 to vector<2x256xf32>
    %227 = arith.select %225, %223, %226 : vector<2x256xi1>, vector<2x256xf32>
    %228 = arith.maximumf %222, %227 : vector<2x256xf32>
    %c240_i32_58 = arith.constant 240 : i32
    %229 = tpu.dynamic_rotate %217 by %c240_i32_58 dim 1 : vector<2x256xf32>, i32 -> vector<2x256xf32>
    %cst_59 = arith.constant 0xFF800000 : f32
    %230 = vector.shape_cast %19 : vector<1x256xi1> to vector<1x256xi1>
    %231 = vector.broadcast %230 : vector<1x256xi1> to vector<2x256xi1>
    %232 = vector.broadcast %cst_59 : f32 to vector<2x256xf32>
    %233 = arith.select %231, %229, %232 : vector<2x256xi1>, vector<2x256xf32>
    %c224_i32_60 = arith.constant 224 : i32
    %234 = tpu.dynamic_rotate %217 by %c224_i32_60 dim 1 : vector<2x256xf32>, i32 -> vector<2x256xf32>
    %cst_61 = arith.constant 0xFF800000 : f32
    %235 = vector.shape_cast %21 : vector<1x256xi1> to vector<1x256xi1>
    %236 = vector.broadcast %235 : vector<1x256xi1> to vector<2x256xi1>
    %237 = vector.broadcast %cst_61 : f32 to vector<2x256xf32>
    %238 = arith.select %236, %234, %237 : vector<2x256xi1>, vector<2x256xf32>
    %239 = arith.maximumf %233, %238 : vector<2x256xf32>
    %240 = arith.maximumf %228, %239 : vector<2x256xf32>
    %241 = arith.maximumf %240, %217 : vector<2x256xf32>
    %c3 = arith.constant 3 : index
    %c0_62 = arith.constant 0 : index
    %c0_63 = arith.constant 0 : index
    %242 = vector.load %arg5[%c3, %c0_62, %c0_63] : memref<4x8x2xf32, #tpu.memory_space<vmem>>, vector<1x8x2xf32>
    %243 = vector.shape_cast %242 : vector<1x8x2xf32> to vector<8x2xf32>
    %244 = vector.extract_strided_slice %243 {offsets = [0, 0], sizes = [8, 1], strides = [1, 1]} : vector<8x2xf32> to vector<8x1xf32>
    %245 = vector.extract_strided_slice %241 {offsets = [0, 0], sizes = [1, 256], strides = [1, 1]} : vector<2x256xf32> to vector<1x256xf32>
    %246 = vector.broadcast %244 : vector<8x1xf32> to vector<8x256xf32>
    %247 = vector.broadcast %245 : vector<1x256xf32> to vector<8x256xf32>
    %248 = arith.mulf %246, %247 : vector<8x256xf32>
    %249 = vector.extract_strided_slice %243 {offsets = [0, 1], sizes = [8, 1], strides = [1, 1]} : vector<8x2xf32> to vector<8x1xf32>
    %250 = vector.extract_strided_slice %241 {offsets = [1, 0], sizes = [1, 256], strides = [1, 1]} : vector<2x256xf32> to vector<1x256xf32>
    %251 = vector.broadcast %249 : vector<8x1xf32> to vector<8x256xf32>
    %252 = vector.broadcast %250 : vector<1x256xf32> to vector<8x256xf32>
    %253 = arith.mulf %251, %252 : vector<8x256xf32>
    %254 = arith.addf %248, %253 : vector<8x256xf32>
    %255 = arith.addf %193, %254 : vector<8x256xf32>
    %256 = arith.negf %255 : vector<8x256xf32>
    %257 = math.exp %256 : vector<8x256xf32>
    %cst_64 = arith.constant 1.000000e+00 : f32
    %258 = vector.broadcast %cst_64 : f32 to vector<8x256xf32>
    %259 = arith.addf %258, %257 : vector<8x256xf32>
    %260 = arith.divf %258, %259 : vector<8x256xf32>
    %261 = arith.mulf %255, %260 : vector<8x256xf32>
    %c0_65 = arith.constant 0 : index
    %c0_66 = arith.constant 0 : index
    %c0_67 = arith.constant 0 : index
    %262 = vector.load %arg7[%c0_65, %c0_66, %c0_67] : memref<2x8x256xf32, #tpu.memory_space<vmem>>, vector<1x8x256xf32>
    %263 = vector.shape_cast %262 : vector<1x8x256xf32> to vector<8x256xf32>
    %264 = vector.shape_cast %261 : vector<8x256xf32> to vector<1x8x256xf32>
    tpu.vector_store %arg7[%c0_65, %c0_66, %c0_67], %264 {strides = array<i32>} : memref<2x8x256xf32, #tpu.memory_space<vmem>>, vector<1x8x256xf32>,
    %c1_68 = arith.constant 1 : index
    %c0_69 = arith.constant 0 : index
    %c0_70 = arith.constant 0 : index
    %265 = vector.load %arg2[%c1_68, %c0_69, %c0_70] : memref<2x4x256xf32, #tpu.memory_space<vmem>>, vector<1x4x256xf32>
    %266 = vector.shape_cast %265 : vector<1x4x256xf32> to vector<4x256xf32>
    %267 = vector.extract_strided_slice %0 {offsets = [0, 0], sizes = [2, 1], strides = [1, 1]} : vector<2x4xf32> to vector<2x1xf32>
    %268 = vector.extract_strided_slice %266 {offsets = [0, 0], sizes = [1, 256], strides = [1, 1]} : vector<4x256xf32> to vector<1x256xf32>
    %269 = vector.broadcast %267 : vector<2x1xf32> to vector<2x256xf32>
    %270 = vector.broadcast %268 : vector<1x256xf32> to vector<2x256xf32>
    %271 = arith.mulf %269, %270 : vector<2x256xf32>
    %272 = vector.extract_strided_slice %0 {offsets = [0, 1], sizes = [2, 1], strides = [1, 1]} : vector<2x4xf32> to vector<2x1xf32>
    %273 = vector.extract_strided_slice %266 {offsets = [1, 0], sizes = [1, 256], strides = [1, 1]} : vector<4x256xf32> to vector<1x256xf32>
    %274 = vector.broadcast %272 : vector<2x1xf32> to vector<2x256xf32>
    %275 = vector.broadcast %273 : vector<1x256xf32> to vector<2x256xf32>
    %276 = arith.mulf %274, %275 : vector<2x256xf32>
    %277 = arith.addf %271, %276 : vector<2x256xf32>
    %278 = vector.extract_strided_slice %0 {offsets = [0, 2], sizes = [2, 1], strides = [1, 1]} : vector<2x4xf32> to vector<2x1xf32>
    %279 = vector.extract_strided_slice %266 {offsets = [2, 0], sizes = [1, 256], strides = [1, 1]} : vector<4x256xf32> to vector<1x256xf32>
    %280 = vector.broadcast %278 : vector<2x1xf32> to vector<2x256xf32>
    %281 = vector.broadcast %279 : vector<1x256xf32> to vector<2x256xf32>
    %282 = arith.mulf %280, %281 : vector<2x256xf32>
    %283 = arith.addf %277, %282 : vector<2x256xf32>
    %284 = vector.extract_strided_slice %0 {offsets = [0, 3], sizes = [2, 1], strides = [1, 1]} : vector<2x4xf32> to vector<2x1xf32>
    %285 = vector.extract_strided_slice %266 {offsets = [3, 0], sizes = [1, 256], strides = [1, 1]} : vector<4x256xf32> to vector<1x256xf32>
    %286 = vector.broadcast %284 : vector<2x1xf32> to vector<2x256xf32>
    %287 = vector.broadcast %285 : vector<1x256xf32> to vector<2x256xf32>
    %288 = arith.mulf %286, %287 : vector<2x256xf32>
    %289 = arith.addf %283, %288 : vector<2x256xf32>
    %290 = vector.broadcast %1 : vector<2x1xf32> to vector<2x256xf32>
    %291 = arith.addf %289, %290 : vector<2x256xf32>
    %292 = arith.negf %291 : vector<2x256xf32>
    %293 = math.exp %292 : vector<2x256xf32>
    %cst_71 = arith.constant 1.000000e+00 : f32
    %294 = vector.broadcast %cst_71 : f32 to vector<2x256xf32>
    %295 = arith.addf %294, %293 : vector<2x256xf32>
    %296 = arith.divf %294, %295 : vector<2x256xf32>
    %297 = arith.mulf %291, %296 : vector<2x256xf32>
    %c0_72 = arith.constant 0 : index
    %c0_73 = arith.constant 0 : index
    %c0_74 = arith.constant 0 : index
    %298 = vector.load %arg5[%c0_72, %c0_73, %c0_74] : memref<4x8x2xf32, #tpu.memory_space<vmem>>, vector<1x8x2xf32>
    %299 = vector.shape_cast %298 : vector<1x8x2xf32> to vector<8x2xf32>
    %300 = vector.extract_strided_slice %299 {offsets = [0, 0], sizes = [8, 1], strides = [1, 1]} : vector<8x2xf32> to vector<8x1xf32>
    %301 = vector.extract_strided_slice %297 {offsets = [0, 0], sizes = [1, 256], strides = [1, 1]} : vector<2x256xf32> to vector<1x256xf32>
    %302 = vector.broadcast %300 : vector<8x1xf32> to vector<8x256xf32>
    %303 = vector.broadcast %301 : vector<1x256xf32> to vector<8x256xf32>
    %304 = arith.mulf %302, %303 : vector<8x256xf32>
    %305 = vector.extract_strided_slice %299 {offsets = [0, 1], sizes = [8, 1], strides = [1, 1]} : vector<8x2xf32> to vector<8x1xf32>
    %306 = vector.extract_strided_slice %297 {offsets = [1, 0], sizes = [1, 256], strides = [1, 1]} : vector<2x256xf32> to vector<1x256xf32>
    %307 = vector.broadcast %305 : vector<8x1xf32> to vector<8x256xf32>
    %308 = vector.broadcast %306 : vector<1x256xf32> to vector<8x256xf32>
    %309 = arith.mulf %307, %308 : vector<8x256xf32>
    %310 = arith.addf %304, %309 : vector<8x256xf32>
    %311 = vector.broadcast %2 : vector<8x1xf32> to vector<8x256xf32>
    %312 = arith.addf %311, %310 : vector<8x256xf32>
    %c2_i32_75 = arith.constant 2 : i32
    %313 = tpu.dynamic_rotate %297 by %c2_i32_75 dim 1 : vector<2x256xf32>, i32 -> vector<2x256xf32>
    %cst_76 = arith.constant 0xFF800000 : f32
    %314 = vector.shape_cast %7 : vector<1x256xi1> to vector<1x256xi1>
    %315 = vector.broadcast %314 : vector<1x256xi1> to vector<2x256xi1>
    %316 = vector.broadcast %cst_76 : f32 to vector<2x256xf32>
    %317 = arith.select %315, %313, %316 : vector<2x256xi1>, vector<2x256xf32>
    %c1_i32_77 = arith.constant 1 : i32
    %318 = tpu.dynamic_rotate %297 by %c1_i32_77 dim 1 : vector<2x256xf32>, i32 -> vector<2x256xf32>
    %cst_78 = arith.constant 0xFF800000 : f32
    %319 = vector.shape_cast %9 : vector<1x256xi1> to vector<1x256xi1>
    %320 = vector.broadcast %319 : vector<1x256xi1> to vector<2x256xi1>
    %321 = vector.broadcast %cst_78 : f32 to vector<2x256xf32>
    %322 = arith.select %320, %318, %321 : vector<2x256xi1>, vector<2x256xf32>
    %323 = arith.maximumf %317, %322 : vector<2x256xf32>
    %c255_i32_79 = arith.constant 255 : i32
    %324 = tpu.dynamic_rotate %297 by %c255_i32_79 dim 1 : vector<2x256xf32>, i32 -> vector<2x256xf32>
    %cst_80 = arith.constant 0xFF800000 : f32
    %325 = vector.shape_cast %11 : vector<1x256xi1> to vector<1x256xi1>
    %326 = vector.broadcast %325 : vector<1x256xi1> to vector<2x256xi1>
    %327 = vector.broadcast %cst_80 : f32 to vector<2x256xf32>
    %328 = arith.select %326, %324, %327 : vector<2x256xi1>, vector<2x256xf32>
    %c254_i32_81 = arith.constant 254 : i32
    %329 = tpu.dynamic_rotate %297 by %c254_i32_81 dim 1 : vector<2x256xf32>, i32 -> vector<2x256xf32>
    %cst_82 = arith.constant 0xFF800000 : f32
    %330 = vector.shape_cast %13 : vector<1x256xi1> to vector<1x256xi1>
    %331 = vector.broadcast %330 : vector<1x256xi1> to vector<2x256xi1>
    %332 = vector.broadcast %cst_82 : f32 to vector<2x256xf32>
    %333 = arith.select %331, %329, %332 : vector<2x256xi1>, vector<2x256xf32>
    %334 = arith.maximumf %328, %333 : vector<2x256xf32>
    %335 = arith.maximumf %323, %334 : vector<2x256xf32>
    %336 = arith.maximumf %335, %297 : vector<2x256xf32>
    %c32_i32_83 = arith.constant 32 : i32
    %337 = tpu.dynamic_rotate %336 by %c32_i32_83 dim 1 : vector<2x256xf32>, i32 -> vector<2x256xf32>
    %cst_84 = arith.constant 0xFF800000 : f32
    %338 = vector.shape_cast %15 : vector<1x256xi1> to vector<1x256xi1>
    %339 = vector.broadcast %338 : vector<1x256xi1> to vector<2x256xi1>
    %340 = vector.broadcast %cst_84 : f32 to vector<2x256xf32>
    %341 = arith.select %339, %337, %340 : vector<2x256xi1>, vector<2x256xf32>
    %c16_i32_85 = arith.constant 16 : i32
    %342 = tpu.dynamic_rotate %336 by %c16_i32_85 dim 1 : vector<2x256xf32>, i32 -> vector<2x256xf32>
    %cst_86 = arith.constant 0xFF800000 : f32
    %343 = vector.shape_cast %17 : vector<1x256xi1> to vector<1x256xi1>
    %344 = vector.broadcast %343 : vector<1x256xi1> to vector<2x256xi1>
    %345 = vector.broadcast %cst_86 : f32 to vector<2x256xf32>
    %346 = arith.select %344, %342, %345 : vector<2x256xi1>, vector<2x256xf32>
    %347 = arith.maximumf %341, %346 : vector<2x256xf32>
    %c240_i32_87 = arith.constant 240 : i32
    %348 = tpu.dynamic_rotate %336 by %c240_i32_87 dim 1 : vector<2x256xf32>, i32 -> vector<2x256xf32>
    %cst_88 = arith.constant 0xFF800000 : f32
    %349 = vector.shape_cast %19 : vector<1x256xi1> to vector<1x256xi1>
    %350 = vector.broadcast %349 : vector<1x256xi1> to vector<2x256xi1>
    %351 = vector.broadcast %cst_88 : f32 to vector<2x256xf32>
    %352 = arith.select %350, %348, %351 : vector<2x256xi1>, vector<2x256xf32>
    %c224_i32_89 = arith.constant 224 : i32
    %353 = tpu.dynamic_rotate %336 by %c224_i32_89 dim 1 : vector<2x256xf32>, i32 -> vector<2x256xf32>
    %cst_90 = arith.constant 0xFF800000 : f32
    %354 = vector.shape_cast %21 : vector<1x256xi1> to vector<1x256xi1>
    %355 = vector.broadcast %354 : vector<1x256xi1> to vector<2x256xi1>
    %356 = vector.broadcast %cst_90 : f32 to vector<2x256xf32>
    %357 = arith.select %355, %353, %356 : vector<2x256xi1>, vector<2x256xf32>
    %358 = arith.maximumf %352, %357 : vector<2x256xf32>
    %359 = arith.maximumf %347, %358 : vector<2x256xf32>
    %360 = arith.maximumf %359, %336 : vector<2x256xf32>
    %c1_91 = arith.constant 1 : index
    %c0_92 = arith.constant 0 : index
    %c0_93 = arith.constant 0 : index
    %361 = vector.load %arg5[%c1_91, %c0_92, %c0_93] : memref<4x8x2xf32, #tpu.memory_space<vmem>>, vector<1x8x2xf32>
    %362 = vector.shape_cast %361 : vector<1x8x2xf32> to vector<8x2xf32>
    %363 = vector.extract_strided_slice %362 {offsets = [0, 0], sizes = [8, 1], strides = [1, 1]} : vector<8x2xf32> to vector<8x1xf32>
    %364 = vector.extract_strided_slice %360 {offsets = [0, 0], sizes = [1, 256], strides = [1, 1]} : vector<2x256xf32> to vector<1x256xf32>
    %365 = vector.broadcast %363 : vector<8x1xf32> to vector<8x256xf32>
    %366 = vector.broadcast %364 : vector<1x256xf32> to vector<8x256xf32>
    %367 = arith.mulf %365, %366 : vector<8x256xf32>
    %368 = vector.extract_strided_slice %362 {offsets = [0, 1], sizes = [8, 1], strides = [1, 1]} : vector<8x2xf32> to vector<8x1xf32>
    %369 = vector.extract_strided_slice %360 {offsets = [1, 0], sizes = [1, 256], strides = [1, 1]} : vector<2x256xf32> to vector<1x256xf32>
    %370 = vector.broadcast %368 : vector<8x1xf32> to vector<8x256xf32>
    %371 = vector.broadcast %369 : vector<1x256xf32> to vector<8x256xf32>
    %372 = arith.mulf %370, %371 : vector<8x256xf32>
    %373 = arith.addf %367, %372 : vector<8x256xf32>
    %374 = arith.addf %312, %373 : vector<8x256xf32>
    %c2_i32_94 = arith.constant 2 : i32
    %375 = tpu.dynamic_rotate %360 by %c2_i32_94 dim 1 : vector<2x256xf32>, i32 -> vector<2x256xf32>
    %cst_95 = arith.constant 0xFF800000 : f32
    %376 = vector.shape_cast %7 : vector<1x256xi1> to vector<1x256xi1>
    %377 = vector.broadcast %376 : vector<1x256xi1> to vector<2x256xi1>
    %378 = vector.broadcast %cst_95 : f32 to vector<2x256xf32>
    %379 = arith.select %377, %375, %378 : vector<2x256xi1>, vector<2x256xf32>
    %c1_i32_96 = arith.constant 1 : i32
    %380 = tpu.dynamic_rotate %360 by %c1_i32_96 dim 1 : vector<2x256xf32>, i32 -> vector<2x256xf32>
    %cst_97 = arith.constant 0xFF800000 : f32
    %381 = vector.shape_cast %9 : vector<1x256xi1> to vector<1x256xi1>
    %382 = vector.broadcast %381 : vector<1x256xi1> to vector<2x256xi1>
    %383 = vector.broadcast %cst_97 : f32 to vector<2x256xf32>
    %384 = arith.select %382, %380, %383 : vector<2x256xi1>, vector<2x256xf32>
    %385 = arith.maximumf %379, %384 : vector<2x256xf32>
    %c255_i32_98 = arith.constant 255 : i32
    %386 = tpu.dynamic_rotate %360 by %c255_i32_98 dim 1 : vector<2x256xf32>, i32 -> vector<2x256xf32>
    %cst_99 = arith.constant 0xFF800000 : f32
    %387 = vector.shape_cast %11 : vector<1x256xi1> to vector<1x256xi1>
    %388 = vector.broadcast %387 : vector<1x256xi1> to vector<2x256xi1>
    %389 = vector.broadcast %cst_99 : f32 to vector<2x256xf32>
    %390 = arith.select %388, %386, %389 : vector<2x256xi1>, vector<2x256xf32>
    %c254_i32_100 = arith.constant 254 : i32
    %391 = tpu.dynamic_rotate %360 by %c254_i32_100 dim 1 : vector<2x256xf32>, i32 -> vector<2x256xf32>
    %cst_101 = arith.constant 0xFF800000 : f32
    %392 = vector.shape_cast %13 : vector<1x256xi1> to vector<1x256xi1>
    %393 = vector.broadcast %392 : vector<1x256xi1> to vector<2x256xi1>
    %394 = vector.broadcast %cst_101 : f32 to vector<2x256xf32>
    %395 = arith.select %393, %391, %394 : vector<2x256xi1>, vector<2x256xf32>
    %396 = arith.maximumf %390, %395 : vector<2x256xf32>
    %397 = arith.maximumf %385, %396 : vector<2x256xf32>
    %398 = arith.maximumf %397, %360 : vector<2x256xf32>
    %c32_i32_102 = arith.constant 32 : i32
    %399 = tpu.dynamic_rotate %398 by %c32_i32_102 dim 1 : vector<2x256xf32>, i32 -> vector<2x256xf32>
    %cst_103 = arith.constant 0xFF800000 : f32
    %400 = vector.shape_cast %15 : vector<1x256xi1> to vector<1x256xi1>
    %401 = vector.broadcast %400 : vector<1x256xi1> to vector<2x256xi1>
    %402 = vector.broadcast %cst_103 : f32 to vector<2x256xf32>
    %403 = arith.select %401, %399, %402 : vector<2x256xi1>, vector<2x256xf32>
    %c16_i32_104 = arith.constant 16 : i32
    %404 = tpu.dynamic_rotate %398 by %c16_i32_104 dim 1 : vector<2x256xf32>, i32 -> vector<2x256xf32>
    %cst_105 = arith.constant 0xFF800000 : f32
    %405 = vector.shape_cast %17 : vector<1x256xi1> to vector<1x256xi1>
    %406 = vector.broadcast %405 : vector<1x256xi1> to vector<2x256xi1>
    %407 = vector.broadcast %cst_105 : f32 to vector<2x256xf32>
    %408 = arith.select %406, %404, %407 : vector<2x256xi1>, vector<2x256xf32>
    %409 = arith.maximumf %403, %408 : vector<2x256xf32>
    %c240_i32_106 = arith.constant 240 : i32
    %410 = tpu.dynamic_rotate %398 by %c240_i32_106 dim 1 : vector<2x256xf32>, i32 -> vector<2x256xf32>
    %cst_107 = arith.constant 0xFF800000 : f32
    %411 = vector.shape_cast %19 : vector<1x256xi1> to vector<1x256xi1>
    %412 = vector.broadcast %411 : vector<1x256xi1> to vector<2x256xi1>
    %413 = vector.broadcast %cst_107 : f32 to vector<2x256xf32>
    %414 = arith.select %412, %410, %413 : vector<2x256xi1>, vector<2x256xf32>
    %c224_i32_108 = arith.constant 224 : i32
    %415 = tpu.dynamic_rotate %398 by %c224_i32_108 dim 1 : vector<2x256xf32>, i32 -> vector<2x256xf32>
    %cst_109 = arith.constant 0xFF800000 : f32
    %416 = vector.shape_cast %21 : vector<1x256xi1> to vector<1x256xi1>
    %417 = vector.broadcast %416 : vector<1x256xi1> to vector<2x256xi1>
    %418 = vector.broadcast %cst_109 : f32 to vector<2x256xf32>
    %419 = arith.select %417, %415, %418 : vector<2x256xi1>, vector<2x256xf32>
    %420 = arith.maximumf %414, %419 : vector<2x256xf32>
    %421 = arith.maximumf %409, %420 : vector<2x256xf32>
    %422 = arith.maximumf %421, %398 : vector<2x256xf32>
    %c2_110 = arith.constant 2 : index
    %c0_111 = arith.constant 0 : index
    %c0_112 = arith.constant 0 : index
    %423 = vector.load %arg5[%c2_110, %c0_111, %c0_112] : memref<4x8x2xf32, #tpu.memory_space<vmem>>, vector<1x8x2xf32>
    %424 = vector.shape_cast %423 : vector<1x8x2xf32> to vector<8x2xf32>
    %425 = vector.extract_strided_slice %424 {offsets = [0, 0], sizes = [8, 1], strides = [1, 1]} : vector<8x2xf32> to vector<8x1xf32>
    %426 = vector.extract_strided_slice %422 {offsets = [0, 0], sizes = [1, 256], strides = [1, 1]} : vector<2x256xf32> to vector<1x256xf32>
    %427 = vector.broadcast %425 : vector<8x1xf32> to vector<8x256xf32>
    %428 = vector.broadcast %426 : vector<1x256xf32> to vector<8x256xf32>
    %429 = arith.mulf %427, %428 : vector<8x256xf32>
    %430 = vector.extract_strided_slice %424 {offsets = [0, 1], sizes = [8, 1], strides = [1, 1]} : vector<8x2xf32> to vector<8x1xf32>
    %431 = vector.extract_strided_slice %422 {offsets = [1, 0], sizes = [1, 256], strides = [1, 1]} : vector<2x256xf32> to vector<1x256xf32>
    %432 = vector.broadcast %430 : vector<8x1xf32> to vector<8x256xf32>
    %433 = vector.broadcast %431 : vector<1x256xf32> to vector<8x256xf32>
    %434 = arith.mulf %432, %433 : vector<8x256xf32>
    %435 = arith.addf %429, %434 : vector<8x256xf32>
    %436 = arith.addf %374, %435 : vector<8x256xf32>
    %c2_i32_113 = arith.constant 2 : i32
    %437 = tpu.dynamic_rotate %422 by %c2_i32_113 dim 1 : vector<2x256xf32>, i32 -> vector<2x256xf32>
    %cst_114 = arith.constant 0xFF800000 : f32
    %438 = vector.shape_cast %7 : vector<1x256xi1> to vector<1x256xi1>
    %439 = vector.broadcast %438 : vector<1x256xi1> to vector<2x256xi1>
    %440 = vector.broadcast %cst_114 : f32 to vector<2x256xf32>
    %441 = arith.select %439, %437, %440 : vector<2x256xi1>, vector<2x256xf32>
    %c1_i32_115 = arith.constant 1 : i32
    %442 = tpu.dynamic_rotate %422 by %c1_i32_115 dim 1 : vector<2x256xf32>, i32 -> vector<2x256xf32>
    %cst_116 = arith.constant 0xFF800000 : f32
    %443 = vector.shape_cast %9 : vector<1x256xi1> to vector<1x256xi1>
    %444 = vector.broadcast %443 : vector<1x256xi1> to vector<2x256xi1>
    %445 = vector.broadcast %cst_116 : f32 to vector<2x256xf32>
    %446 = arith.select %444, %442, %445 : vector<2x256xi1>, vector<2x256xf32>
    %447 = arith.maximumf %441, %446 : vector<2x256xf32>
    %c255_i32_117 = arith.constant 255 : i32
    %448 = tpu.dynamic_rotate %422 by %c255_i32_117 dim 1 : vector<2x256xf32>, i32 -> vector<2x256xf32>
    %cst_118 = arith.constant 0xFF800000 : f32
    %449 = vector.shape_cast %11 : vector<1x256xi1> to vector<1x256xi1>
    %450 = vector.broadcast %449 : vector<1x256xi1> to vector<2x256xi1>
    %451 = vector.broadcast %cst_118 : f32 to vector<2x256xf32>
    %452 = arith.select %450, %448, %451 : vector<2x256xi1>, vector<2x256xf32>
    %c254_i32_119 = arith.constant 254 : i32
    %453 = tpu.dynamic_rotate %422 by %c254_i32_119 dim 1 : vector<2x256xf32>, i32 -> vector<2x256xf32>
    %cst_120 = arith.constant 0xFF800000 : f32
    %454 = vector.shape_cast %13 : vector<1x256xi1> to vector<1x256xi1>
    %455 = vector.broadcast %454 : vector<1x256xi1> to vector<2x256xi1>
    %456 = vector.broadcast %cst_120 : f32 to vector<2x256xf32>
    %457 = arith.select %455, %453, %456 : vector<2x256xi1>, vector<2x256xf32>
    %458 = arith.maximumf %452, %457 : vector<2x256xf32>
    %459 = arith.maximumf %447, %458 : vector<2x256xf32>
    %460 = arith.maximumf %459, %422 : vector<2x256xf32>
    %c32_i32_121 = arith.constant 32 : i32
    %461 = tpu.dynamic_rotate %460 by %c32_i32_121 dim 1 : vector<2x256xf32>, i32 -> vector<2x256xf32>
    %cst_122 = arith.constant 0xFF800000 : f32
    %462 = vector.shape_cast %15 : vector<1x256xi1> to vector<1x256xi1>
    %463 = vector.broadcast %462 : vector<1x256xi1> to vector<2x256xi1>
    %464 = vector.broadcast %cst_122 : f32 to vector<2x256xf32>
    %465 = arith.select %463, %461, %464 : vector<2x256xi1>, vector<2x256xf32>
    %c16_i32_123 = arith.constant 16 : i32
    %466 = tpu.dynamic_rotate %460 by %c16_i32_123 dim 1 : vector<2x256xf32>, i32 -> vector<2x256xf32>
    %cst_124 = arith.constant 0xFF800000 : f32
    %467 = vector.shape_cast %17 : vector<1x256xi1> to vector<1x256xi1>
    %468 = vector.broadcast %467 : vector<1x256xi1> to vector<2x256xi1>
    %469 = vector.broadcast %cst_124 : f32 to vector<2x256xf32>
    %470 = arith.select %468, %466, %469 : vector<2x256xi1>, vector<2x256xf32>
    %471 = arith.maximumf %465, %470 : vector<2x256xf32>
    %c240_i32_125 = arith.constant 240 : i32
    %472 = tpu.dynamic_rotate %460 by %c240_i32_125 dim 1 : vector<2x256xf32>, i32 -> vector<2x256xf32>
    %cst_126 = arith.constant 0xFF800000 : f32
    %473 = vector.shape_cast %19 : vector<1x256xi1> to vector<1x256xi1>
    %474 = vector.broadcast %473 : vector<1x256xi1> to vector<2x256xi1>
    %475 = vector.broadcast %cst_126 : f32 to vector<2x256xf32>
    %476 = arith.select %474, %472, %475 : vector<2x256xi1>, vector<2x256xf32>
    %c224_i32_127 = arith.constant 224 : i32
    %477 = tpu.dynamic_rotate %460 by %c224_i32_127 dim 1 : vector<2x256xf32>, i32 -> vector<2x256xf32>
    %cst_128 = arith.constant 0xFF800000 : f32
    %478 = vector.shape_cast %21 : vector<1x256xi1> to vector<1x256xi1>
    %479 = vector.broadcast %478 : vector<1x256xi1> to vector<2x256xi1>
    %480 = vector.broadcast %cst_128 : f32 to vector<2x256xf32>
    %481 = arith.select %479, %477, %480 : vector<2x256xi1>, vector<2x256xf32>
    %482 = arith.maximumf %476, %481 : vector<2x256xf32>
    %483 = arith.maximumf %471, %482 : vector<2x256xf32>
    %484 = arith.maximumf %483, %460 : vector<2x256xf32>
    %c3_129 = arith.constant 3 : index
    %c0_130 = arith.constant 0 : index
    %c0_131 = arith.constant 0 : index
    %485 = vector.load %arg5[%c3_129, %c0_130, %c0_131] : memref<4x8x2xf32, #tpu.memory_space<vmem>>, vector<1x8x2xf32>
    %486 = vector.shape_cast %485 : vector<1x8x2xf32> to vector<8x2xf32>
    %487 = vector.extract_strided_slice %486 {offsets = [0, 0], sizes = [8, 1], strides = [1, 1]} : vector<8x2xf32> to vector<8x1xf32>
    %488 = vector.extract_strided_slice %484 {offsets = [0, 0], sizes = [1, 256], strides = [1, 1]} : vector<2x256xf32> to vector<1x256xf32>
    %489 = vector.broadcast %487 : vector<8x1xf32> to vector<8x256xf32>
    %490 = vector.broadcast %488 : vector<1x256xf32> to vector<8x256xf32>
    %491 = arith.mulf %489, %490 : vector<8x256xf32>
    %492 = vector.extract_strided_slice %486 {offsets = [0, 1], sizes = [8, 1], strides = [1, 1]} : vector<8x2xf32> to vector<8x1xf32>
    %493 = vector.extract_strided_slice %484 {offsets = [1, 0], sizes = [1, 256], strides = [1, 1]} : vector<2x256xf32> to vector<1x256xf32>
    %494 = vector.broadcast %492 : vector<8x1xf32> to vector<8x256xf32>
    %495 = vector.broadcast %493 : vector<1x256xf32> to vector<8x256xf32>
    %496 = arith.mulf %494, %495 : vector<8x256xf32>
    %497 = arith.addf %491, %496 : vector<8x256xf32>
    %498 = arith.addf %436, %497 : vector<8x256xf32>
    %499 = arith.negf %498 : vector<8x256xf32>
    %500 = math.exp %499 : vector<8x256xf32>
    %cst_132 = arith.constant 1.000000e+00 : f32
    %501 = vector.broadcast %cst_132 : f32 to vector<8x256xf32>
    %502 = arith.addf %501, %500 : vector<8x256xf32>
    %503 = arith.divf %501, %502 : vector<8x256xf32>
    %504 = arith.mulf %498, %503 : vector<8x256xf32>
    %c1_133 = arith.constant 1 : index
    %c0_134 = arith.constant 0 : index
    %c0_135 = arith.constant 0 : index
    %505 = vector.load %arg7[%c1_133, %c0_134, %c0_135] : memref<2x8x256xf32, #tpu.memory_space<vmem>>, vector<1x8x256xf32>
    %506 = vector.shape_cast %505 : vector<1x8x256xf32> to vector<8x256xf32>
    %507 = vector.shape_cast %504 : vector<8x256xf32> to vector<1x8x256xf32>
    tpu.vector_store %arg7[%c1_133, %c0_134, %c0_135], %507 {strides = array<i32>} : memref<2x8x256xf32, #tpu.memory_space<vmem>>, vector<1x8x256xf32>,
    return
  }
  func.func @transform_0(%arg0: i32, %arg1: i32) -> (i32, i32, i32) {
    %c0_i32 = arith.constant 0 : i32
    %c0_i32_0 = arith.constant 0 : i32
    %c0_i32_1 = arith.constant 0 : i32
    return %arg0, %c0_i32, %c0_i32_0 : i32, i32, i32
  }
  func.func @transform_1(%arg0: i32, %arg1: i32) -> (i32, i32) {
    %c0_i32 = arith.constant 0 : i32
    %c0_i32_0 = arith.constant 0 : i32
    %c0_i32_1 = arith.constant 0 : i32
    return %c0_i32, %c0_i32_0 : i32, i32
  }
  func.func @transform_2(%arg0: i32, %arg1: i32) -> (i32, i32) {
    %c0_i32 = arith.constant 0 : i32
    %c0_i32_0 = arith.constant 0 : i32
    %c0_i32_1 = arith.constant 0 : i32
    return %c0_i32, %c0_i32_0 : i32, i32
  }
  func.func @transform_3(%arg0: i32, %arg1: i32) -> (i32, i32, i32) {
    %c0_i32 = arith.constant 0 : i32
    %c0_i32_0 = arith.constant 0 : i32
    %c0_i32_1 = arith.constant 0 : i32
    return %c0_i32, %arg1, %c0_i32_0 : i32, i32, i32
  }
  func.func @transform_4(%arg0: i32, %arg1: i32) -> (i32, i32) {
    %c0_i32 = arith.constant 0 : i32
    %c0_i32_0 = arith.constant 0 : i32
    return %arg1, %c0_i32 : i32, i32
  }
  func.func @transform_5(%arg0: i32, %arg1: i32) -> (i32, i32, i32) {
    %c0_i32 = arith.constant 0 : i32
    %c0_i32_0 = arith.constant 0 : i32
    return %arg0, %arg1, %c0_i32 : i32, i32, i32
  }
}

</mosaic_0001>

<bundles_post_ra>
// kernel: sppf_pallas.1
= control target key start
LH: loop header
LB: loop body
LE: loop exit
PB: predicated region body
PF: predicated region fallthrough
CT: control target
= control target key end

     0   :  { %v1185_v0 = vmov 0   ;;  %v1186_v2 = vmov 2   ;;  %v1187_v3 = vmov 1   ;;  %v1188_v4 = vmov 3   ;;  %s1191_s25 = smov 127   ;;  %s1192_s26 = smov 126   ;;  %s2052_s1 = inlined_call_operand.vmem [shape: f32[2,4], index: 1, kind: input, shape index: {}]   ;;  %s2053_s2 = inlined_call_operand.vmem [shape: f32[2,1], index: 2, kind: input, shape index: {}]   ;;  %s2054_s0 = inlined_call_operand.vmem [shape: f32[2,4,256], index: 0, kind: input, shape index: {}]   ;;  %s2055_s3 = inlined_call_operand.vmem [shape: f32[4,8,2], index: 3, kind: input, shape index: {}]   ;;  %s2056_s4 = inlined_call_operand.vmem [shape: f32[8,1], index: 4, kind: input, shape index: {}]   ;;  %s2057_s5 = inlined_call_operand.vmem [shape: f32[2,8,256], index: 5, kind: output, shape index: {}]  }
   0x1   :  { %1141 = vset.pattern.permute.xlu0 %v1185_v0  ;;  %v20_v1 = vld [vmem:[%s2052_s1] sm:$0x3]  ;;  %1143 = vset.pattern.permute.xlu1 %v1186_v2  ;;  %v23_v6 = vlaneseq  ;;  %v1119_v12 = vld [vmem:[%s2054_s0 + $0x8] sm:$0xff]  ;;  %s1193_s27 = smov 32   ;;  %s1194_s28 = smov 16  }
   0x2   :  { %47 = vperm.xlu0 %1141, %v20_v1   ;;  %98 = vperm.xlu1 %1143, %v20_v1   ;;  %v21_v5 = vld [vmem:[%s2053_s2] sm:$0x3]  ;;  %s1190_s2 = smov 1   ;;  %s1195_s29 = smov 112  }
   0x3   :  { %v52_v7 = vshrl.u32 %v23_v6, 7  ;;  %v44_v11 = vld [vmem:[%s2054_s0] sm:$0xff]  ;;  %s1189_s0 = smov 2   ;;  %s1196_s30 = smov 96  }
   0x5   :  { %v1238_v8 = vsub.s32 0, %v52_v7  ;;  %v57_v9 = vsub.s32 4, %v52_v7  ;;  %v1240_v10 = vsub.s32 1, %v52_v7  ;;  %v81_v13 = vsub.s32 5, %v52_v7 }
   0x6   :  { %1142 = vset.pattern.permute.xlu0 %v1187_v3  ;;  %1144 = vset.pattern.permute.xlu1 %v1188_v4  ;;  %v103_v14 = vsub.s32 2, %v52_v7  ;;  %v107_v15 = vsub.s32 6, %v52_v7  ;;  %v1248_v16 = vsub.s32 3, %v52_v7  ;;  %v133_v17 = vsub.s32 7, %v52_v7 }
   0x7   :  { %72 = vperm.xlu0 %1142, %v20_v1   ;;  %124 = vperm.xlu1 %1144, %v20_v1   ;;  %v54_v18 = vrot.slane %v44_v11, %v1238_v8  ;;  %v58_v19 = vrot.slane %v44_v11, %v57_v9  ;;  %v616_v20 = vrot.slane %v1119_v12, %v1238_v8 }
   0x8   :  { %v78_v21 = vrot.slane %v44_v11, %v1240_v10  ;;  %v82_v22 = vrot.slane %v44_v11, %v81_v13  ;;  %v636_v23 = vrot.slane %v1119_v12, %v1240_v10  ;;  %v640_v24 = vrot.slane %v1119_v12, %v81_v13 }
   0x9   :  { %v620_v25 = vrot.slane %v1119_v12, %v57_v9  ;;  %v104_v26 = vrot.slane %v44_v11, %v103_v14  ;;  %v108_v27 = vrot.slane %v44_v11, %v107_v15  ;;  %v130_v28 = vrot.slane %v44_v11, %v1248_v16 }
   0xa   :  { %v658_v31 = vrot.slane %v1119_v12, %v103_v14  ;;  %v662_v32 = vrot.slane %v1119_v12, %v107_v15  ;;  %v134_v33 = vrot.slane %v44_v11, %v133_v17  ;;  %v64_v34 = vrot.slane %v54_v18, %v1238_v8 }
   0xb   :  { %1145 = vset.pattern.permute.xlu1 %v1185_v0  ;;  %v68_v35 = vrot.slane %v58_v19, %v1238_v8  ;;  %v626_v36 = vrot.slane %v616_v20, %v1238_v8  ;;  %v680_v37 = vrot.slane %v1119_v12, %v1248_v16  ;;  %v88_v38 = vrot.slane %v78_v21, %v1240_v10 }
   0xc   :  { %151 = vperm.xlu1 %1145, %v21_v5   ;;  %v92_v39 = vrot.slane %v82_v22, %v1240_v10  ;;  %v646_v40 = vrot.slane %v636_v23, %v1240_v10  ;;  %v650_v41 = vrot.slane %v640_v24, %v1240_v10  ;;  %v630_v42 = vrot.slane %v620_v25, %v1238_v8 }
   0xd   :  { %v114_v43 = vrot.slane %v104_v26, %v103_v14  ;;  %v118_v44 = vrot.slane %v108_v27, %v103_v14  ;;  %v140_v45 = vrot.slane %v130_v28, %v1248_v16  ;;  %v668_v46 = vrot.slane %v658_v31, %v103_v14 }
   0xe   :  { %v672_v47 = vrot.slane %v662_v32, %v103_v14  ;;  %v144_v48 = vrot.slane %v134_v33, %v1248_v16  ;;  %v684_v49 = vrot.slane %v1119_v12, %v133_v17  ;;  %v690_v55 = vrot.slane %v680_v37, %v1248_v16 }
  0x10   :  { %1146 = vset.pattern.permute.xlu1 %v1187_v3  ;;  %v694_v9 = vrot.slane %v684_v49, %v1248_v16 }
  0x81   :  { %v48_v29 = vpop.permute.xlu0 %47  ;;  %v99_v30 = vpop.permute.xlu1 %98 }
  0x82   :  { %v69_v50 = vmul.f32 %v64_v34, %v48_v29  ;;  %v70_v51 = vmul.f32 %v68_v35, %v48_v29  ;;  %v631_v52 = vmul.f32 %v626_v36, %v48_v29  ;;  %v632_v60 = vmul.f32 %v630_v42, %v48_v29 }
  0x83   :  { %v119_v61 = vmul.f32 %v114_v43, %v99_v30  ;;  %v120_v62 = vmul.f32 %v118_v44, %v99_v30  ;;  %v673_v11 = vmul.f32 %v668_v46, %v99_v30  ;;  %v674_v14 = vmul.f32 %v672_v47, %v99_v30 }
  0x86   :  { %v73_v53 = vpop.permute.xlu0 %72  ;;  %v125_v54 = vpop.permute.xlu1 %124 }
  0x87   :  { %v93_v56 = vmul.f32 %v88_v38, %v73_v53  ;;  %v94_v57 = vmul.f32 %v92_v39, %v73_v53  ;;  %v651_v58 = vmul.f32 %v646_v40, %v73_v53  ;;  %v652_v59 = vmul.f32 %v650_v41, %v73_v53 }
  0x88   :  { %v145_v63 = vmul.f32 %v140_v45, %v125_v54  ;;  %v146_v5 = vmul.f32 %v144_v48, %v125_v54  ;;  %v695_v17 = vmul.f32 %v690_v55, %v125_v54  ;;  %v696_v21 = vmul.f32 %v694_v9, %v125_v54 }
  0x89   :  { %v95_v1 = vadd.f32 %v93_v56, %v69_v50  ;;  %v96_v2 = vadd.f32 %v94_v57, %v70_v51  ;;  %v653_v4 = vadd.f32 %v651_v58, %v631_v52  ;;  %v654_v7 = vadd.f32 %v652_v59, %v632_v60 }
  0x8a   :  { %v1309_v48 = vand.u32 127, %v23_v6 }
  0x8b   :  { %v121_v12 = vadd.f32 %v119_v61, %v95_v1  ;;  %v122_v13 = vadd.f32 %v120_v62, %v96_v2  ;;  %v152_v15 = vpop.permute.xlu1 %151  ;;  %v675_v20 = vadd.f32 %v673_v11, %v653_v4  ;;  %v676_v22 = vadd.f32 %v674_v14, %v654_v7 }
  0x8c   :  { %v1312_v51 = vadd.s32 128, %v1309_v48  ;;  %v1315_v53 = vand.u32 15, %v1309_v48  ;;  %vm226_vm0 = vcmp.lt.s32.totalorder %v1309_v48, 1  ;;  %vm213_vm1 = vcmp.lt.s32.totalorder %v1309_v48, 2 }
  0x8d   :  { %v147_v18 = vadd.f32 %v145_v63, %v121_v12  ;;  %v148_v19 = vadd.f32 %v146_v5, %v122_v13  ;;  %v697_v27 = vadd.f32 %v695_v17, %v675_v20  ;;  %v698_v28 = vadd.f32 %v696_v21, %v676_v22 }
  0x8e   :  { %v1318_v54 = vand.u32 15, %v1312_v51  ;;  %vm28_vm2 = vcmp.ge.s32.totalorder %v1315_v53, 2  ;;  %vm30_vm4 = vcmp.ge.s32.totalorder %v1315_v53, 1  ;;  %vm241_vm5 = vcmp.lt.s32.totalorder %v1309_v48, 127 }
  0x8f   :  { %v154_v23 = vadd.f32 %v152_v15, %v147_v18  ;;  %v155_v24 = vadd.f32 %v152_v15, %v148_v19  ;;  %v699_v16 = vadd.f32 %v697_v27, %v152_v15  ;;  %v700_v29 = vadd.f32 %v698_v28, %v152_v15 }
  0x90   :  { %vm29_vm3 = vcmp.ge.s32.totalorder %v1318_v54, 2  ;;  %vm31_vm6 = vcmp.ge.s32.totalorder %v1318_v54, 1  ;;  %vm2061_vm7 = vcmp.lt.s32.totalorder %v1315_v53, 15  ;;  %vm2060_vm8 = vcmp.lt.s32.totalorder %v1318_v54, 15 }
  0x91   :  { %v1112_v25 = vmul.f32 -1.442695, %v154_v23  ;;  %v1113_v26 = vmul.f32 -1.442695, %v155_v24  ;;  %v1120_v31 = vmul.f32 -1.442695, %v699_v16 }
  0x92   :  { %v1121_v32 = vmul.f32 -1.442695, %v700_v29  ;;  %vm2066_vm9 = vcmp.lt.s32.totalorder %v1309_v48, 126  ;;  %vm2059_vm10 = vcmp.lt.s32.totalorder %v1315_v53, 14  ;;  %vm2058_vm11 = vcmp.lt.s32.totalorder %v1318_v54, 14 }
  0x93   :  { %1153 = vpow2.f32 %v1112_v25  ;;  %vm286_vm12 = vcmp.lt.s32.totalorder %v1309_v48, 16  ;;  %vm273_vm13 = vcmp.lt.s32.totalorder %v1309_v48, 32  ;;  %vm38_vm14 = vcmp.ge.s32.totalorder %v1309_v48, 16 }
  0x94   :  { %1155 = vpow2.f32 %v1113_v26  ;;  %vm2067_vm15 = vcmp.lt.s32.totalorder %v1309_v48, 112 }
  0x95   :  { %1157 = vpow2.f32 %v1120_v31 }
  0x96   :  { %1159 = vpow2.f32 %v1121_v32 }
  0x9d   :  { %v1154_v30 = vpop.eup %1153 }
  0x9e   :  { %v1156_v33 = vpop.eup %1155  ;;  %v162_v34 = vadd.f32 1.0, %v1154_v30 }
  0x9f   :  { %v163_v35 = vadd.f32 1.0, %v1156_v33  ;;  %v1158_v36 = vpop.eup %1157 }
  0xa0   :  { %1161 = vrcp.f32 %v162_v34  ;;  %v1160_v37 = vpop.eup %1159  ;;  %v707_v39 = vadd.f32 1.0, %v1158_v36 }
  0xa1   :  { %1163 = vrcp.f32 %v163_v35  ;;  %v708_v42 = vadd.f32 1.0, %v1160_v37 }
  0xa2   :  { %1165 = vrcp.f32 %v707_v39 }
  0xa3   :  { %1167 = vrcp.f32 %v708_v42 }
  0xaa   :  { %v1162_v38 = vpop.eup %1161 }
  0xab   :  { %v1164_v40 = vpop.eup %1163  ;;  %v1268_v41 = vmul.f32 %v1162_v38, %v154_v23 }
  0xac   :  { %v1270_v43 = vmul.f32 %v1164_v40, %v155_v24  ;;  %v1166_v44 = vpop.eup %1165 }
  0xad   :  { %209 = vrot.lane.b32.xlu0 %v1268_v41, %s1189_s0  ;;  %v1168_v45 = vpop.eup %1167  ;;  %v1288_v46 = vmul.f32 %v1166_v44, %v699_v16 }
  0xae   :  { %211 = vrot.lane.b32.xlu1 %v1270_v43, %s1189_s0  ;;  %v1290_v47 = vmul.f32 %v1168_v45, %v700_v29 }
  0xb1   :  { %222 = vrot.lane.b32.xlu0 %v1268_v41, %s1190_s2 }
  0xb2   :  { %224 = vrot.lane.b32.xlu1 %v1270_v43, %s1190_s2 }
  0xb5   :  { %237 = vrot.lane.b32.xlu0 %v1268_v41, %s1191_s25 }
  0xb6   :  { %239 = vrot.lane.b32.xlu1 %v1270_v43, %s1191_s25 }
  0xb9   :  { %250 = vrot.lane.b32.xlu0 %v1268_v41, %s1192_s26 }
  0xba   :  { %252 = vrot.lane.b32.xlu1 %v1270_v43, %s1192_s26 }
  0xbd   :  { %749 = vrot.lane.b32.xlu0 %v1288_v46, %s1189_s0 }
  0xbe   :  { %751 = vrot.lane.b32.xlu1 %v1290_v47, %s1189_s0 }
  0xc1   :  { %757 = vrot.lane.b32.xlu0 %v1288_v46, %s1190_s2 }
  0xc2   :  { %759 = vrot.lane.b32.xlu1 %v1290_v47, %s1190_s2 }
  0xc5   :  { %767 = vrot.lane.b32.xlu0 %v1288_v46, %s1191_s25 }
  0xc6   :  { %769 = vrot.lane.b32.xlu1 %v1290_v47, %s1191_s25 }
  0xc9   :  { %775 = vrot.lane.b32.xlu0 %v1288_v46, %s1192_s26 }
  0xca   :  { %777 = vrot.lane.b32.xlu1 %v1290_v47, %s1192_s26 }
 0x11f   :  { %v210_v49 = vpop.permute.xlu0 %209 }
 0x120   :  { %v212_v50 = vpop.permute.xlu1 %211 }
 0x121   :  { %v214_v59 = vsel %vm213_vm1, %v210_v49, %v212_v50  ;;  %v215_v60 = vsel %vm213_vm1, %v212_v50, %v210_v49 }
 0x122   :  { %v220_v5 = vsel %vm28_vm2, %v215_v60, -inf  ;;  %v221_v7 = vsel %vm29_vm3, %v214_v59, -inf }
 0x123   :  { %v223_v52 = vpop.permute.xlu0 %222 }
 0x124   :  { %v225_v55 = vpop.permute.xlu1 %224 }
 0x125   :  { %v227_v57 = vsel %vm226_vm0, %v223_v52, %v225_v55  ;;  %v228_v58 = vsel %vm226_vm0, %v225_v55, %v223_v52 }
 0x126   :  { %v233_v1 = vsel %vm30_vm4, %v228_v58, -inf  ;;  %v234_v2 = vsel %vm31_vm6, %v227_v57, -inf }
 0x127   :  { %v238_v56 = vpop.permute.xlu0 %237  ;;  %v235_v17 = vmax.f32 %v220_v5, %v233_v1  ;;  %v236_v18 = vmax.f32 %v221_v7, %v234_v2 }
 0x128   :  { %v240_v6 = vpop.permute.xlu1 %239 }
 0x129   :  { %v242_v61 = vsel %vm241_vm5, %v238_v56, %v240_v6  ;;  %v243_v62 = vsel %vm241_vm5, %v240_v6, %v238_v56 }
 0x12a   :  { %v248_v12 = vsel %vm2061_vm7, %v242_v61, -inf  ;;  %v249_v13 = vsel %vm2060_vm8, %v243_v62, -inf }
 0x12b   :  { %v251_v63 = vpop.permute.xlu0 %250 }
 0x12c   :  { %v253_v4 = vpop.permute.xlu1 %252 }
 0x12d   :  { %v255_v9 = vsel %vm2066_vm9, %v251_v63, %v253_v4  ;;  %v256_v11 = vsel %vm2066_vm9, %v253_v4, %v251_v63 }
 0x12e   :  { %v261_v14 = vsel %vm2059_vm10, %v255_v9, -inf  ;;  %v262_v15 = vsel %vm2058_vm11, %v256_v11, -inf }
 0x12f   :  { %v263_v19 = vmax.f32 %v248_v12, %v261_v14  ;;  %v264_v20 = vmax.f32 %v249_v13, %v262_v15  ;;  %v750_v21 = vpop.permute.xlu0 %749 }
 0x130   :  { %v752_v22 = vpop.permute.xlu1 %751 }
 0x131   :  { %v265_v23 = vmax.f32 %v235_v17, %v263_v19  ;;  %v266_v24 = vmax.f32 %v236_v18, %v264_v20  ;;  %v753_v30 = vsel %vm213_vm1, %v750_v21, %v752_v22  ;;  %v754_v33 = vsel %vm213_vm1, %v752_v22, %v750_v21 }
 0x132   :  { %v755_v40 = vsel %vm28_vm2, %v754_v33, -inf  ;;  %v756_v42 = vsel %vm29_vm3, %v753_v30, -inf }
 0x133   :  { %v1365_v25 = vmax.f32 %v265_v23, %v1268_v41  ;;  %v1368_v26 = vmax.f32 %v266_v24, %v1270_v43  ;;  %v758_v27 = vpop.permute.xlu0 %757 }
 0x134   :  { %v760_v28 = vpop.permute.xlu1 %759 }
 0x135   :  { %271 = vrot.lane.b32.xlu1 %v1368_v26, %s1193_s27  ;;  %269 = vrot.lane.b32.xlu0 %v1365_v25, %s1193_s27  ;;  %v761_v31 = vsel %vm226_vm0, %v758_v27, %v760_v28  ;;  %v762_v32 = vsel %vm226_vm0, %v760_v28, %v758_v27 }
 0x136   :  { %v763_v37 = vsel %vm30_vm4, %v762_v32, -inf  ;;  %v764_v38 = vsel %vm31_vm6, %v761_v31, -inf }
 0x137   :  { %v768_v16 = vpop.permute.xlu0 %767  ;;  %v765_v56 = vmax.f32 %v755_v40, %v763_v37  ;;  %v766_v6 = vmax.f32 %v756_v42, %v764_v38 }
 0x138   :  { %v770_v29 = vpop.permute.xlu1 %769 }
 0x139   :  { %284 = vrot.lane.b32.xlu1 %v1368_v26, %s1194_s28  ;;  %282 = vrot.lane.b32.xlu0 %v1365_v25, %s1194_s28  ;;  %v771_v34 = vsel %vm241_vm5, %v768_v16, %v770_v29  ;;  %v772_v35 = vsel %vm241_vm5, %v770_v29, %v768_v16 }
 0x13a   :  { %v773_v49 = vsel %vm2061_vm7, %v771_v34, -inf  ;;  %v774_v50 = vsel %vm2060_vm8, %v772_v35, -inf  ;;  %vm2063_vm8 = vcmp.lt.s32.totalorder %v1312_v51, 240  ;;  %vm2062_vm7 = vcmp.lt.s32.totalorder %v1312_v51, 224 }
 0x13b   :  { %v776_v36 = vpop.permute.xlu0 %775 }
 0x13c   :  { %v778_v39 = vpop.permute.xlu1 %777 }
 0x13d   :  { %v779_v44 = vsel %vm2066_vm9, %v776_v36, %v778_v39  ;;  %v780_v45 = vsel %vm2066_vm9, %v778_v39, %v776_v36  ;;  %299 = vrot.lane.b32.xlu1 %v1368_v26, %s1195_s29  ;;  %297 = vrot.lane.b32.xlu0 %v1365_v25, %s1195_s29 }
 0x13e   :  { %v781_v52 = vsel %vm2059_vm10, %v779_v44, -inf  ;;  %v782_v55 = vsel %vm2058_vm11, %v780_v45, -inf  ;;  %vm2065_vm11 = vcmp.ge.s32.totalorder %v1309_v48, 32  ;;  %vm2064_vm10 = vcmp.lt.s32.totalorder %v1309_v48, 96 }
 0x13f   :  { %v783_v57 = vmax.f32 %v773_v49, %v781_v52  ;;  %v784_v58 = vmax.f32 %v774_v50, %v782_v55 }
 0x141   :  { %v785_v59 = vmax.f32 %v765_v56, %v783_v57  ;;  %v786_v60 = vmax.f32 %v766_v6, %v784_v58  ;;  %312 = vrot.lane.b32.xlu1 %v1368_v26, %s1196_s30  ;;  %310 = vrot.lane.b32.xlu0 %v1365_v25, %s1196_s30 }
 0x143   :  { %v1419_v61 = vmax.f32 %v785_v59, %v1288_v46  ;;  %v1422_v62 = vmax.f32 %v786_v60, %v1290_v47 }
 0x145   :  { %791 = vrot.lane.b32.xlu1 %v1422_v62, %s1193_s27  ;;  %789 = vrot.lane.b32.xlu0 %v1419_v61, %s1193_s27 }
 0x149   :  { %799 = vrot.lane.b32.xlu1 %v1422_v62, %s1194_s28  ;;  %797 = vrot.lane.b32.xlu0 %v1419_v61, %s1194_s28 }
 0x14d   :  { %809 = vrot.lane.b32.xlu1 %v1422_v62, %s1195_s29  ;;  %807 = vrot.lane.b32.xlu0 %v1419_v61, %s1195_s29 }
 0x151   :  { %817 = vrot.lane.b32.xlu1 %v1422_v62, %s1196_s30  ;;  %815 = vrot.lane.b32.xlu0 %v1419_v61, %s1196_s30 }
 0x1a7   :  { %v272_v63 = vpop.permute.xlu1 %271  ;;  %v270_v1 = vpop.permute.xlu0 %269 }
 0x1a8   :  { %v275_v11 = vsel %vm273_vm13, %v272_v63, %v270_v1  ;;  %v274_v14 = vsel %vm273_vm13, %v270_v1, %v272_v63 }
 0x1a9   :  { %v280_v19 = vsel %vm2065_vm11, %v275_v11, -inf }
 0x1ab   :  { %v285_v2 = vpop.permute.xlu1 %284  ;;  %v283_v4 = vpop.permute.xlu0 %282 }
 0x1ac   :  { %v288_v5 = vsel %vm286_vm12, %v285_v2, %v283_v4  ;;  %v287_v15 = vsel %vm286_vm12, %v283_v4, %v285_v2 }
 0x1ad   :  { %v293_v12 = vsel %vm38_vm14, %v288_v5, -inf  ;;  %v296_v16 = vmax.f32 %v274_v14, %v287_v15 }
 0x1ae   :  { %v295_v23 = vmax.f32 %v280_v19, %v293_v12 }
 0x1af   :  { %v300_v7 = vpop.permute.xlu1 %299  ;;  %v298_v9 = vpop.permute.xlu0 %297 }
 0x1b0   :  { %v303_v13 = vsel %vm2067_vm15, %v300_v7, %v298_v9  ;;  %v302_v20 = vsel %vm2067_vm15, %v298_v9, %v300_v7 }
 0x1b1   :  { %v309_v24 = vsel %vm2063_vm8, %v303_v13, -inf }
 0x1b3   :  { %v313_v17 = vpop.permute.xlu1 %312  ;;  %v311_v18 = vpop.permute.xlu0 %310 }
 0x1b4   :  { %v315_v21 = vsel %vm2064_vm10, %v311_v18, %v313_v17  ;;  %v316_v22 = vsel %vm2064_vm10, %v313_v17, %v311_v18 }
 0x1b5   :  { %v322_v27 = vsel %vm2062_vm7, %v316_v22, -inf  ;;  %v323_v28 = vmax.f32 %v302_v20, %v315_v21 }
 0x1b6   :  { %v324_v29 = vmax.f32 %v309_v24, %v322_v27 }
 0x1b7   :  { %v325_v31 = vmax.f32 %v295_v23, %v323_v28  ;;  %v792_v32 = vpop.permute.xlu1 %791  ;;  %v790_v30 = vpop.permute.xlu0 %789 }
 0x1b8   :  { %v326_v33 = vmax.f32 %v296_v16, %v324_v29  ;;  %v793_v44 = vsel %vm273_vm13, %v790_v30, %v792_v32 }
 0x1b9   :  { %v1473_v34 = vmax.f32 %v325_v31, %v1365_v25 }
 0x1ba   :  { %v1476_v35 = vmax.f32 %v326_v33, %v1368_v26  ;;  %v794_v26 = vsel %vm273_vm13, %v792_v32, %v790_v30 }
 0x1bb   :  { %v800_v36 = vpop.permute.xlu1 %799  ;;  %364 = vrot.lane.b32.xlu0 %v1473_v34, %s1189_s0  ;;  %v798_v37 = vpop.permute.xlu0 %797  ;;  %v795_v52 = vsel %vm2065_vm11, %v794_v26, -inf  ;;  %vm2071_vm11 = vcmp.lt.s32.totalorder %v1318_v54, 14 }
 0x1bc   :  { %366 = vrot.lane.b32.xlu1 %v1476_v35, %s1189_s0  ;;  %v802_v38 = vsel %vm286_vm12, %v800_v36, %v798_v37  ;;  %v801_v45 = vsel %vm286_vm12, %v798_v37, %v800_v36 }
 0x1bd   :  { %v803_v40 = vsel %vm38_vm14, %v802_v38, -inf  ;;  %v806_v63 = vmax.f32 %v793_v44, %v801_v45 }
 0x1be   :  { %v805_v57 = vmax.f32 %v795_v52, %v803_v40 }
 0x1bf   :  { %v810_v39 = vpop.permute.xlu1 %809  ;;  %372 = vrot.lane.b32.xlu0 %v1473_v34, %s1190_s2  ;;  %v808_v25 = vpop.permute.xlu0 %807 }
 0x1c0   :  { %374 = vrot.lane.b32.xlu1 %v1476_v35, %s1190_s2  ;;  %v812_v42 = vsel %vm2067_vm15, %v810_v39, %v808_v25  ;;  %v811_v55 = vsel %vm2067_vm15, %v808_v25, %v810_v39 }
 0x1c1   :  { %v814_v58 = vsel %vm2063_vm8, %v812_v42, -inf  ;;  %vm2069_vm8 = vcmp.lt.s32.totalorder %v1318_v54, 15 }
 0x1c3   :  { %v818_v49 = vpop.permute.xlu1 %817  ;;  %382 = vrot.lane.b32.xlu0 %v1473_v34, %s1191_s25  ;;  %v816_v50 = vpop.permute.xlu0 %815 }
 0x1c4   :  { %v819_v56 = vsel %vm2064_vm10, %v816_v50, %v818_v49  ;;  %v820_v6 = vsel %vm2064_vm10, %v818_v49, %v816_v50  ;;  %384 = vrot.lane.b32.xlu1 %v1476_v35, %s1191_s25  ;;  %vm2070_vm10 = vcmp.lt.s32.totalorder %v1315_v53, 14 }
 0x1c5   :  { %v822_v59 = vsel %vm2062_vm7, %v820_v6, -inf  ;;  %v823_v60 = vmax.f32 %v811_v55, %v819_v56  ;;  %vm2068_vm7 = vcmp.lt.s32.totalorder %v1315_v53, 15 }
 0x1c6   :  { %v824_v1 = vmax.f32 %v814_v58, %v822_v59 }
 0x1c7   :  { %v825_v2 = vmax.f32 %v805_v57, %v823_v60  ;;  %390 = vrot.lane.b32.xlu0 %v1473_v34, %s1192_s26 }
 0x1c8   :  { %v826_v4 = vmax.f32 %v806_v63, %v824_v1  ;;  %392 = vrot.lane.b32.xlu1 %v1476_v35, %s1192_s26 }
 0x1c9   :  { %v1519_v5 = vmax.f32 %v825_v2, %v1419_v61 }
 0x1ca   :  { %v1522_v7 = vmax.f32 %v826_v4, %v1422_v62 }
 0x1cb   :  { %863 = vrot.lane.b32.xlu0 %v1519_v5, %s1189_s0 }
 0x1cc   :  { %865 = vrot.lane.b32.xlu1 %v1522_v7, %s1189_s0 }
 0x1cf   :  { %871 = vrot.lane.b32.xlu0 %v1519_v5, %s1190_s2 }
 0x1d0   :  { %873 = vrot.lane.b32.xlu1 %v1522_v7, %s1190_s2 }
 0x1d3   :  { %881 = vrot.lane.b32.xlu0 %v1519_v5, %s1191_s25 }
 0x1d4   :  { %883 = vrot.lane.b32.xlu1 %v1522_v7, %s1191_s25 }
 0x1d7   :  { %889 = vrot.lane.b32.xlu0 %v1519_v5, %s1192_s26 }
 0x1d8   :  { %891 = vrot.lane.b32.xlu1 %v1522_v7, %s1192_s26 }
 0x22d   :  { %v365_v61 = vpop.permute.xlu0 %364 }
 0x22e   :  { %v367_v62 = vpop.permute.xlu1 %366 }
 0x22f   :  { %v368_v17 = vsel %vm213_vm1, %v365_v61, %v367_v62  ;;  %v369_v18 = vsel %vm213_vm1, %v367_v62, %v365_v61 }
 0x230   :  { %v370_v27 = vsel %vm28_vm2, %v369_v18, -inf  ;;  %v371_v28 = vsel %vm29_vm3, %v368_v17, -inf }
 0x231   :  { %v373_v9 = vpop.permute.xlu0 %372 }
 0x232   :  { %v375_v11 = vpop.permute.xlu1 %374 }
 0x233   :  { %v376_v14 = vsel %vm226_vm0, %v373_v9, %v375_v11  ;;  %v377_v15 = vsel %vm226_vm0, %v375_v11, %v373_v9 }
 0x234   :  { %v378_v22 = vsel %vm30_vm4, %v377_v15, -inf  ;;  %v379_v23 = vsel %vm31_vm6, %v376_v14, -inf }
 0x235   :  { %v383_v12 = vpop.permute.xlu0 %382  ;;  %v380_v36 = vmax.f32 %v370_v27, %v378_v22  ;;  %v381_v37 = vmax.f32 %v371_v28, %v379_v23 }
 0x236   :  { %v385_v13 = vpop.permute.xlu1 %384 }
 0x237   :  { %v386_v19 = vsel %vm241_vm5, %v383_v12, %v385_v13  ;;  %v387_v20 = vsel %vm241_vm5, %v385_v13, %v383_v12 }
 0x238   :  { %v388_v31 = vsel %vm2068_vm7, %v386_v19, -inf  ;;  %v389_v32 = vsel %vm2069_vm8, %v387_v20, -inf }
 0x239   :  { %v391_v21 = vpop.permute.xlu0 %390 }
 0x23a   :  { %v393_v24 = vpop.permute.xlu1 %392 }
 0x23b   :  { %v394_v16 = vsel %vm2066_vm9, %v391_v21, %v393_v24  ;;  %v395_v29 = vsel %vm2066_vm9, %v393_v24, %v391_v21 }
 0x23c   :  { %v396_v30 = vsel %vm2070_vm10, %v394_v16, -inf  ;;  %v397_v33 = vsel %vm2071_vm11, %v395_v29, -inf }
 0x23d   :  { %v398_v38 = vmax.f32 %v388_v31, %v396_v30  ;;  %v399_v39 = vmax.f32 %v389_v32, %v397_v33  ;;  %v864_v25 = vpop.permute.xlu0 %863 }
 0x23e   :  { %v866_v26 = vpop.permute.xlu1 %865 }
 0x23f   :  { %v400_v40 = vmax.f32 %v380_v36, %v398_v38  ;;  %v401_v42 = vmax.f32 %v381_v37, %v399_v39  ;;  %v867_v57 = vsel %vm213_vm1, %v864_v25, %v866_v26  ;;  %v868_v58 = vsel %vm213_vm1, %v866_v26, %v864_v25 }
 0x240   :  { %v869_v61 = vsel %vm28_vm2, %v868_v58, -inf  ;;  %v870_v62 = vsel %vm29_vm3, %v867_v57, -inf }
 0x241   :  { %v1573_v44 = vmax.f32 %v400_v40, %v1473_v34  ;;  %v1576_v45 = vmax.f32 %v401_v42, %v1476_v35  ;;  %v872_v49 = vpop.permute.xlu0 %871 }
 0x242   :  { %v874_v50 = vpop.permute.xlu1 %873 }
 0x243   :  { %406 = vrot.lane.b32.xlu1 %v1576_v45, %s1193_s27  ;;  %404 = vrot.lane.b32.xlu0 %v1573_v44, %s1193_s27  ;;  %v875_v56 = vsel %vm226_vm0, %v872_v49, %v874_v50  ;;  %v876_v6 = vsel %vm226_vm0, %v874_v50, %v872_v49 }
 0x244   :  { %v877_v1 = vsel %vm30_vm4, %v876_v6, -inf  ;;  %v878_v2 = vsel %vm31_vm6, %v875_v56, -inf }
 0x245   :  { %v882_v52 = vpop.permute.xlu0 %881  ;;  %v879_v17 = vmax.f32 %v869_v61, %v877_v1  ;;  %v880_v18 = vmax.f32 %v870_v62, %v878_v2 }
 0x246   :  { %v884_v55 = vpop.permute.xlu1 %883 }
 0x247   :  { %414 = vrot.lane.b32.xlu1 %v1576_v45, %s1194_s28  ;;  %412 = vrot.lane.b32.xlu0 %v1573_v44, %s1194_s28  ;;  %v885_v59 = vsel %vm241_vm5, %v882_v52, %v884_v55  ;;  %v886_v60 = vsel %vm241_vm5, %v884_v55, %v882_v52 }
 0x248   :  { %v887_v12 = vsel %vm2068_vm7, %v885_v59, -inf  ;;  %v888_v13 = vsel %vm2069_vm8, %v886_v60, -inf  ;;  %vm2072_vm7 = vcmp.ge.s32.totalorder %v1309_v48, 32  ;;  %vm2073_vm8 = vcmp.lt.s32.totalorder %v1309_v48, 96 }
 0x249   :  { %v890_v63 = vpop.permute.xlu0 %889 }
 0x24a   :  { %v892_v4 = vpop.permute.xlu1 %891 }
 0x24b   :  { %v893_v9 = vsel %vm2066_vm9, %v890_v63, %v892_v4  ;;  %v894_v11 = vsel %vm2066_vm9, %v892_v4, %v890_v63  ;;  %424 = vrot.lane.b32.xlu1 %v1576_v45, %s1195_s29  ;;  %422 = vrot.lane.b32.xlu0 %v1573_v44, %s1195_s29  ;;  %vm2076_vm9 = vcmp.lt.s32.totalorder %v1312_v51, 224 }
 0x24c   :  { %v895_v14 = vsel %vm2070_vm10, %v893_v9, -inf  ;;  %v896_v15 = vsel %vm2071_vm11, %v894_v11, -inf  ;;  %vm2074_vm10 = vmmov %vm2073_vm8  ;;  %vm2075_vm11 = vcmp.lt.s32.totalorder %v1312_v51, 240 }
 0x24d   :  { %v897_v19 = vmax.f32 %v887_v12, %v895_v14  ;;  %v898_v20 = vmax.f32 %v888_v13, %v896_v15 }
 0x24f   :  { %v899_v21 = vmax.f32 %v879_v17, %v897_v19  ;;  %v900_v22 = vmax.f32 %v880_v18, %v898_v20  ;;  %432 = vrot.lane.b32.xlu1 %v1576_v45, %s1196_s30  ;;  %430 = vrot.lane.b32.xlu0 %v1573_v44, %s1196_s30 }
 0x251   :  { %v1627_v23 = vmax.f32 %v899_v21, %v1519_v5  ;;  %v1630_v24 = vmax.f32 %v900_v22, %v1522_v7 }
 0x253   :  { %905 = vrot.lane.b32.xlu1 %v1630_v24, %s1193_s27  ;;  %903 = vrot.lane.b32.xlu0 %v1627_v23, %s1193_s27 }
 0x257   :  { %913 = vrot.lane.b32.xlu1 %v1630_v24, %s1194_s28  ;;  %911 = vrot.lane.b32.xlu0 %v1627_v23, %s1194_s28 }
 0x25b   :  { %923 = vrot.lane.b32.xlu1 %v1630_v24, %s1195_s29  ;;  %921 = vrot.lane.b32.xlu0 %v1627_v23, %s1195_s29 }
 0x25f   :  { %931 = vrot.lane.b32.xlu1 %v1630_v24, %s1196_s30  ;;  %929 = vrot.lane.b32.xlu0 %v1627_v23, %s1196_s30 }
 0x2b5   :  { %v407_v27 = vpop.permute.xlu1 %406  ;;  %v405_v28 = vpop.permute.xlu0 %404 }
 0x2b6   :  { %v409_v33 = vsel %vm273_vm13, %v407_v27, %v405_v28  ;;  %v408_v38 = vsel %vm273_vm13, %v405_v28, %v407_v27 }
 0x2b7   :  { %v410_v40 = vsel %vm2072_vm7, %v409_v33, -inf }
 0x2b9   :  { %v415_v16 = vpop.permute.xlu1 %414  ;;  %v413_v29 = vpop.permute.xlu0 %412 }
 0x2ba   :  { %v417_v31 = vsel %vm286_vm12, %v415_v16, %v413_v29  ;;  %v416_v39 = vsel %vm286_vm12, %v413_v29, %v415_v16 }
 0x2bb   :  { %v418_v36 = vsel %vm38_vm14, %v417_v31, -inf  ;;  %v421_v57 = vmax.f32 %v408_v38, %v416_v39  ;;  %v1115_v38 = vld [vmem:[%s2055_s3 + $0x10] sm:$0xff]  ;;  %v1755_v39 = vld [vmem:[%s2055_s3 + $0x18] sm:$0xff] }
 0x2bc   :  { %v420_v52 = vmax.f32 %v410_v40, %v418_v36 }
 0x2bd   :  { %v425_v32 = vpop.permute.xlu1 %424  ;;  %v423_v30 = vpop.permute.xlu0 %422 }
 0x2be   :  { %v427_v37 = vsel %vm2067_vm15, %v425_v32, %v423_v30  ;;  %v426_v42 = vsel %vm2067_vm15, %v423_v30, %v425_v32 }
 0x2bf   :  { %v429_v55 = vsel %vm2075_vm11, %v427_v37, -inf }
 0x2c1   :  { %v433_v25 = vpop.permute.xlu1 %432  ;;  %v431_v26 = vpop.permute.xlu0 %430 }
 0x2c2   :  { %v434_v49 = vsel %vm2073_vm8, %v431_v26, %v433_v25  ;;  %v435_v50 = vsel %vm2074_vm10, %v433_v25, %v431_v26  ;;  %vm2080_vm10 = vmmov %vm2075_vm11  ;;  %vm2081_vm11 = vcmp.lt.s32.totalorder %v1312_v51, 224  ;;  %v22_v25 = vld [vmem:[%s2056_s4] sm:$0xff] }
 0x2c3   :  { %v437_v56 = vsel %vm2076_vm9, %v435_v50, -inf  ;;  %v438_v6 = vmax.f32 %v426_v42, %v434_v49  ;;  %vm2077_vm9 = vmmov %vm2072_vm7 }
 0x2c4   :  { %v439_v58 = vmax.f32 %v429_v55, %v437_v56  ;;  %vm2078_vm7 = vmmov %vm2073_vm8 }
 0x2c5   :  { %v440_v59 = vmax.f32 %v420_v52, %v438_v6  ;;  %v906_v60 = vpop.permute.xlu1 %905  ;;  %v904_v63 = vpop.permute.xlu0 %903  ;;  %vm2079_vm8 = vmmov %vm2078_vm7 }
 0x2c6   :  { %v441_v1 = vmax.f32 %v421_v57, %v439_v58  ;;  %v907_v14 = vsel %vm273_vm13, %v904_v63, %v906_v60 }
 0x2c7   :  { %v1673_v2 = vmax.f32 %v440_v59, %v1573_v44 }
 0x2c8   :  { %v1676_v4 = vmax.f32 %v441_v1, %v1576_v45  ;;  %v908_v45 = vsel %vm273_vm13, %v906_v60, %v904_v63 }
 0x2c9   :  { %v914_v61 = vpop.permute.xlu1 %913  ;;  %479 = vrot.lane.b32.xlu0 %v1673_v2, %s1189_s0  ;;  %v912_v62 = vpop.permute.xlu0 %911  ;;  %v909_v19 = vsel %vm2077_vm9, %v908_v45, -inf  ;;  %vm2082_vm9 = vcmp.lt.s32.totalorder %v1309_v48, 126 }
 0x2ca   :  { %481 = vrot.lane.b32.xlu1 %v1676_v4, %s1189_s0  ;;  %v916_v9 = vsel %vm286_vm12, %v914_v61, %v912_v62  ;;  %v915_v15 = vsel %vm286_vm12, %v912_v62, %v914_v61 }
 0x2cb   :  { %v917_v12 = vsel %vm38_vm14, %v916_v9, -inf  ;;  %v920_v31 = vmax.f32 %v907_v14, %v915_v15 }
 0x2cc   :  { %v919_v27 = vmax.f32 %v909_v19, %v917_v12 }
 0x2cd   :  { %v924_v11 = vpop.permute.xlu1 %923  ;;  %487 = vrot.lane.b32.xlu0 %v1673_v2, %s1190_s2  ;;  %v922_v44 = vpop.permute.xlu0 %921 }
 0x2ce   :  { %489 = vrot.lane.b32.xlu1 %v1676_v4, %s1190_s2  ;;  %v926_v13 = vsel %vm2067_vm15, %v924_v11, %v922_v44  ;;  %v925_v20 = vsel %vm2067_vm15, %v922_v44, %v924_v11  ;;  %vm2087_vm15 = vcmp.lt.s32.totalorder %v1318_v54, 14 }
 0x2cf   :  { %v928_v28 = vsel %vm2080_vm10, %v926_v13, -inf  ;;  %vm2085_vm10 = vcmp.lt.s32.totalorder %v1318_v54, 15 }
 0x2d1   :  { %v932_v17 = vpop.permute.xlu1 %931  ;;  %497 = vrot.lane.b32.xlu0 %v1673_v2, %s1191_s25  ;;  %v930_v18 = vpop.permute.xlu0 %929 }
 0x2d2   :  { %v933_v21 = vsel %vm2078_vm7, %v930_v18, %v932_v17  ;;  %v934_v22 = vsel %vm2079_vm8, %v932_v17, %v930_v18  ;;  %499 = vrot.lane.b32.xlu1 %v1676_v4, %s1191_s25  ;;  %vm2083_vm7 = vmmov %vm2082_vm9  ;;  %vm2084_vm8 = vcmp.lt.s32.totalorder %v1315_v53, 15 }
 0x2d3   :  { %v936_v16 = vsel %vm2081_vm11, %v934_v22, -inf  ;;  %v937_v29 = vmax.f32 %v925_v20, %v933_v21  ;;  %vm2086_vm11 = vcmp.lt.s32.totalorder %v1315_v53, 14 }
 0x2d4   :  { %v938_v32 = vmax.f32 %v928_v28, %v936_v16 }
 0x2d5   :  { %v939_v30 = vmax.f32 %v919_v27, %v937_v29  ;;  %505 = vrot.lane.b32.xlu0 %v1673_v2, %s1192_s26 }
 0x2d6   :  { %v940_v33 = vmax.f32 %v920_v31, %v938_v32  ;;  %507 = vrot.lane.b32.xlu1 %v1676_v4, %s1192_s26 }
 0x2d7   :  { %v1719_v36 = vmax.f32 %v939_v30, %v1627_v23  ;;  %v715_v23 = vld [vmem:[%s2055_s3] sm:$0xff] }
 0x2d8   :  { %v1722_v37 = vmax.f32 %v940_v33, %v1630_v24  ;;  %v1122_v24 = vld [vmem:[%s2055_s3 + $0x8] sm:$0xff] }
 0x2d9   :  { %977 = vrot.lane.b32.xlu0 %v1719_v36, %s1189_s0 }
 0x2da   :  { %979 = vrot.lane.b32.xlu1 %v1722_v37, %s1189_s0 }
 0x2dd   :  { %985 = vrot.lane.b32.xlu0 %v1719_v36, %s1190_s2 }
 0x2de   :  { %987 = vrot.lane.b32.xlu1 %v1722_v37, %s1190_s2 }
 0x2e1   :  { %995 = vrot.lane.b32.xlu0 %v1719_v36, %s1191_s25 }
 0x2e2   :  { %997 = vrot.lane.b32.xlu1 %v1722_v37, %s1191_s25 }
 0x2e5   :  { %1003 = vrot.lane.b32.xlu0 %v1719_v36, %s1192_s26 }
 0x2e6   :  { %1005 = vrot.lane.b32.xlu1 %v1722_v37, %s1192_s26 }
 0x2e9   :  { %732 = vperm.xlu0 %1142, %v715_v23  }
 0x2ea   :  { %187 = vperm.xlu1 %1146, %v715_v23  }
 0x2ed   :  { %1148 = vset.pattern.permute.xlu0 %v1185_v0 }
 0x2ee   :  { %1147 = vset.pattern.permute.xlu1 %v1185_v0  ;;  %173 = vperm.xlu0 %1148, %v715_v23  }
 0x2ef   :  { %718 = vperm.xlu1 %1147, %v715_v23  }
 0x2f2   :  { %832 = vperm.xlu0 %1148, %v1122_v24  }
 0x2f3   :  { %333 = vperm.xlu1 %1147, %v1122_v24  }
 0x2f6   :  { %448 = vperm.xlu0 %1148, %v1115_v38  }
 0x2f7   :  { %1149 = vset.pattern.permute.xlu1 %v1187_v3 }
 0x2f8   :  { %347 = vperm.xlu1 %1149, %v1122_v24  }
 0x2fa   :  { %946 = vperm.xlu0 %1148, %v1115_v38  }
 0x2fc   :  { %846 = vperm.xlu1 %1149, %v1122_v24  }
 0x2fe   :  { %563 = vperm.xlu0 %1148, %v1755_v39  }
 0x300   :  { %1150 = vset.pattern.permute.xlu1 %v1185_v0 }
 0x301   :  { %204 = vperm.xlu1 %1150, %v22_v25  }
 0x305   :  { %1151 = vset.pattern.permute.xlu1 %v1187_v3 }
 0x306   :  { %462 = vperm.xlu1 %1151, %v1115_v38  }
 0x30a   :  { %960 = vperm.xlu1 %1151, %v1115_v38  }
 0x30e   :  { %577 = vperm.xlu1 %1151, %v1755_v39  }
 0x33b   :  { %v480_v26 = vpop.permute.xlu0 %479 }
 0x33c   :  { %v482_v40 = vpop.permute.xlu1 %481 }
 0x33d   :  { %v483_v0 = vsel %vm213_vm1, %v480_v26, %v482_v40  ;;  %v484_v6 = vsel %vm213_vm1, %v482_v40, %v480_v26 }
 0x33e   :  { %v485_v61 = vsel %vm28_vm2, %v484_v6, -inf  ;;  %v486_v62 = vsel %vm29_vm3, %v483_v0, -inf }
 0x33f   :  { %v488_v42 = vpop.permute.xlu0 %487 }
 0x340   :  { %v490_v49 = vpop.permute.xlu1 %489 }
 0x341   :  { %v491_v55 = vsel %vm226_vm0, %v488_v42, %v490_v49  ;;  %v492_v56 = vsel %vm226_vm0, %v490_v49, %v488_v42 }
 0x342   :  { %v493_v60 = vsel %vm30_vm4, %v492_v56, -inf  ;;  %v494_v63 = vsel %vm31_vm6, %v491_v55, -inf }
 0x343   :  { %v498_v50 = vpop.permute.xlu0 %497  ;;  %v495_v14 = vmax.f32 %v485_v61, %v493_v60  ;;  %v496_v15 = vmax.f32 %v486_v62, %v494_v63 }
 0x344   :  { %v500_v52 = vpop.permute.xlu1 %499 }
 0x345   :  { %v501_v57 = vsel %vm241_vm5, %v498_v50, %v500_v52  ;;  %v502_v58 = vsel %vm241_vm5, %v500_v52, %v498_v50 }
 0x346   :  { %v503_v44 = vsel %vm2084_vm8, %v501_v57, -inf  ;;  %v504_v45 = vsel %vm2085_vm10, %v502_v58, -inf }
 0x347   :  { %v506_v59 = vpop.permute.xlu0 %505 }
 0x348   :  { %v508_v1 = vpop.permute.xlu1 %507 }
 0x349   :  { %v509_v9 = vsel %vm2082_vm9, %v506_v59, %v508_v1  ;;  %v510_v11 = vsel %vm2083_vm7, %v508_v1, %v506_v59 }
 0x34a   :  { %v511_v12 = vsel %vm2086_vm11, %v509_v9, -inf  ;;  %v512_v13 = vsel %vm2087_vm15, %v510_v11, -inf }
 0x34b   :  { %v513_v17 = vmax.f32 %v503_v44, %v511_v12  ;;  %v514_v18 = vmax.f32 %v504_v45, %v512_v13  ;;  %v978_v19 = vpop.permute.xlu0 %977  ;;  %v742_v44 = vrot.slane %v1290_v47, %v1240_v10  ;;  %v728_v45 = vrot.slane %v1290_v47, %v1238_v8 }
 0x34c   :  { %v980_v20 = vpop.permute.xlu1 %979 }
 0x34d   :  { %v515_v21 = vmax.f32 %v495_v14, %v513_v17  ;;  %v516_v22 = vmax.f32 %v496_v15, %v514_v18  ;;  %v981_v23 = vsel %vm213_vm1, %v978_v19, %v980_v20  ;;  %v982_v24 = vsel %vm213_vm1, %v980_v20, %v978_v19 }
 0x34e   :  { %v983_v50 = vsel %vm28_vm2, %v982_v24, -inf  ;;  %v984_v52 = vsel %vm29_vm3, %v981_v23, -inf  ;;  %vm2091_vm2 = vmmov %vm2085_vm10  ;;  %v197_v24 = vrot.slane %v1270_v43, %v1240_v10  ;;  %vm2099_vm10 = vcmp.lt.s32.totalorder %v1312_v51, 240 }
 0x34f   :  { %v1797_v27 = vmax.f32 %v515_v21, %v1673_v2  ;;  %v1800_v28 = vmax.f32 %v516_v22, %v1676_v4  ;;  %v986_v16 = vpop.permute.xlu0 %985  ;;  %vm2092_vm3 = vmmov %vm2086_vm11  ;;  %vm2100_vm11 = vcmp.lt.s32.totalorder %v1312_v51, 224 }
 0x350   :  { %v988_v29 = vpop.permute.xlu1 %987 }
 0x351   :  { %521 = vrot.lane.b32.xlu0 %v1800_v28, %s1193_s27  ;;  %519 = vrot.lane.b32.xlu1 %v1797_v27, %s1193_s27  ;;  %v989_v30 = vsel %vm226_vm0, %v986_v16, %v988_v29  ;;  %v990_v33 = vsel %vm226_vm0, %v988_v29, %v986_v16  ;;  %vm2088_vm0 = vmmov %vm2083_vm7  ;;  %vm2097_vm7 = vcmp.lt.s32.totalorder %v1309_v48, 96 }
 0x352   :  { %v991_v40 = vsel %vm30_vm4, %v990_v33, -inf  ;;  %v992_v42 = vsel %vm31_vm6, %v989_v30, -inf  ;;  %vm2089_vm1 = vmmov %vm2088_vm0  ;;  %vm2094_vm6 = vcmp.lt.s32.totalorder %v1309_v48, 112 }
 0x353   :  { %v996_v31 = vpop.permute.xlu0 %995  ;;  %vm2090_vm4 = vmmov %vm2084_vm8  ;;  %v993_v59 = vmax.f32 %v983_v50, %v991_v40  ;;  %v994_v60 = vmax.f32 %v984_v52, %v992_v42  ;;  %v339_v50 = vrot.slane %v1473_v34, %v1238_v8  ;;  %v343_v52 = vrot.slane %v1476_v35, %v1238_v8 }
 0x354   :  { %v998_v32 = vpop.permute.xlu1 %997  ;;  %vm2096_vm9 = vmmov %vm2094_vm6 }
 0x355   :  { %529 = vrot.lane.b32.xlu0 %v1800_v28, %s1194_s28  ;;  %527 = vrot.lane.b32.xlu1 %v1797_v27, %s1194_s28  ;;  %v999_v38 = vsel %vm241_vm5, %v996_v31, %v998_v32  ;;  %v1000_v25 = vsel %vm241_vm5, %v998_v32, %v996_v31  ;;  %vm2093_vm5 = vmmov %vm2087_vm15  ;;  %vm2095_vm15 = vcmp.ge.s32.totalorder %v1309_v48, 32 }
 0x356   :  { %v1001_v0 = vsel %vm2090_vm4, %v999_v38, -inf  ;;  %v1002_v6 = vsel %vm2091_vm2, %v1000_v25, -inf  ;;  %v193_v38 = vrot.slane %v1268_v41, %v1240_v10  ;;  %v179_v25 = vrot.slane %v1268_v41, %v1238_v8  ;;  %vm2098_vm8 = vmmov %vm2097_vm7 }
 0x357   :  { %v1004_v26 = vpop.permute.xlu0 %1003  ;;  %v454_v41 = vrot.slane %v1673_v2, %v1238_v8 }
 0x358   :  { %v1006_v49 = vpop.permute.xlu1 %1005 }
 0x359   :  { %v1007_v55 = vsel %vm2088_vm0, %v1004_v26, %v1006_v49  ;;  %v1008_v56 = vsel %vm2089_vm1, %v1006_v49, %v1004_v26  ;;  %539 = vrot.lane.b32.xlu0 %v1800_v28, %s1195_s29  ;;  %537 = vrot.lane.b32.xlu1 %v1797_v27, %s1195_s29  ;;  %v183_v49 = vrot.slane %v1270_v43, %v1238_v8  ;;  %vm2101_vm0 = vmmov %vm2094_vm6 }
 0x35a   :  { %v1009_v57 = vsel %vm2092_vm3, %v1007_v55, -inf  ;;  %v1010_v58 = vsel %vm2093_vm5, %v1008_v56, -inf  ;;  %v353_v55 = vrot.slane %v1473_v34, %v1240_v10  ;;  %v357_v56 = vrot.slane %v1476_v35, %v1240_v10  ;;  %vm2102_vm1 = vmmov %vm2097_vm7 }
 0x35b   :  { %v1011_v63 = vmax.f32 %v1001_v0, %v1009_v57  ;;  %v1012_v1 = vmax.f32 %v1002_v6, %v1010_v58  ;;  %v468_v0 = vrot.slane %v1673_v2, %v1240_v10  ;;  %v458_v57 = vrot.slane %v1676_v4, %v1238_v8  ;;  %vm2103_vm4 = vmmov %vm2102_vm1 }
 0x35c   :  { %vm2104_vm2 = vmmov %vm2101_vm0 }
 0x35d   :  { %v1013_v61 = vmax.f32 %v993_v59, %v1011_v63  ;;  %v1014_v62 = vmax.f32 %v994_v60, %v1012_v1  ;;  %547 = vrot.lane.b32.xlu0 %v1800_v28, %s1196_s30  ;;  %545 = vrot.lane.b32.xlu1 %v1797_v27, %s1196_s30  ;;  %vm2105_vm3 = vmmov %vm2100_vm11 }
 0x35e   :  { %vm2106_vm5 = vmmov %vm2099_vm10 }
 0x35f   :  { %v1851_v9 = vmax.f32 %v1013_v61, %v1719_v36  ;;  %v1854_v53 = vmax.f32 %v1014_v62, %v1722_v37 }
 0x361   :  { %1019 = vrot.lane.b32.xlu0 %v1854_v53, %s1193_s27  ;;  %1017 = vrot.lane.b32.xlu1 %v1851_v9, %s1193_s27 }
 0x365   :  { %1027 = vrot.lane.b32.xlu0 %v1854_v53, %s1194_s28  ;;  %1025 = vrot.lane.b32.xlu1 %v1851_v9, %s1194_s28 }
 0x368   :  { %v1870_v11 = vpop.permute.xlu0 %732 }
 0x369   :  { %v1864_v54 = vpop.permute.xlu1 %187  ;;  %1037 = vrot.lane.b32.xlu0 %v1854_v53, %s1195_s29  ;;  %1035 = vrot.lane.b32.xlu1 %v1851_v9, %s1195_s29  ;;  %v744_v13 = vmul.f32 %v742_v44, %v1870_v11 }
 0x36a   :  { %v198_v6 = vmul.f32 %v193_v38, %v1864_v54 }
 0x36d   :  { %1045 = vrot.lane.b32.xlu0 %v1854_v53, %s1196_s30  ;;  %1043 = vrot.lane.b32.xlu1 %v1851_v9, %s1196_s30  ;;  %v174_v47 = vpop.permute.xlu0 %173 }
 0x36e   :  { %v1880_v12 = vpop.permute.xlu1 %718  ;;  %v184_v59 = vmul.f32 %v179_v25, %v174_v47  ;;  %v185_v60 = vmul.f32 %v183_v49, %v174_v47 }
 0x36f   :  { %v730_v14 = vmul.f32 %v728_v45, %v1880_v12 }
 0x370   :  { %v200_v25 = vadd.f32 %v198_v6, %v184_v59 }
 0x371   :  { %v1884_v15 = vadd.f32 %v744_v13, %v730_v14  ;;  %1060 = vperm.xlu0 %1148, %v1755_v39   ;;  %1074 = vperm.xlu1 %1151, %v1755_v39   ;;  %v1895_v21 = vpop.permute.xlu0 %832 }
 0x372   :  { %v1889_v17 = vpop.permute.xlu1 %333 }
 0x375   :  { %1152 = vset.pattern.permute.xlu0 %v1187_v3  ;;  %v449_v16 = vpop.permute.xlu0 %448 }
 0x377   :  { %v348_v18 = vpop.permute.xlu1 %347 }
 0x379   :  { %v1899_v31 = vpop.permute.xlu0 %946 }
 0x37b   :  { %v1891_v19 = vpop.permute.xlu1 %846 }
 0x37d   :  { %v1903_v39 = vpop.permute.xlu0 %563 }
 0x380   :  { %v1893_v20 = vpop.permute.xlu1 %204 }
 0x385   :  { %v463_v22 = vpop.permute.xlu1 %462 }
 0x389   :  { %v1897_v29 = vpop.permute.xlu1 %960 }
 0x38d   :  { %v1901_v32 = vpop.permute.xlu1 %577 }
 0x3c3   :  { %v520_v3 = vpop.permute.xlu1 %519  ;;  %v522_v30 = vpop.permute.xlu0 %521 }
 0x3c4   :  { %v524_v43 = vsel %vm273_vm13, %v522_v30, %v520_v3  ;;  %v523_v35 = vsel %vm273_vm13, %v520_v3, %v522_v30  ;;  %v199_v30 = vmul.f32 %v197_v24, %v1864_v54  ;;  %v207_v54 = vadd.f32 %v1893_v20, %v200_v25 }
 0x3c5   :  { %v525_v61 = vsel %vm2095_vm15, %v524_v43, -inf }
 0x3c7   :  { %v528_v33 = vpop.permute.xlu1 %527  ;;  %v530_v23 = vpop.permute.xlu0 %529 }
 0x3c8   :  { %v532_v26 = vsel %vm286_vm12, %v530_v23, %v528_v33  ;;  %v531_v2 = vsel %vm286_vm12, %v528_v33, %v530_v23  ;;  %v472_v33 = vrot.slane %v1676_v4, %v1240_v10  ;;  %v345_v4 = vmul.f32 %v343_v52, %v1889_v17 }
 0x3c9   :  { %v533_v34 = vsel %vm38_vm14, %v532_v26, -inf  ;;  %v536_v23 = vmax.f32 %v523_v35, %v531_v2  ;;  %v358_v26 = vmul.f32 %v353_v55, %v348_v18  ;;  %v460_v35 = vmul.f32 %v458_v57, %v449_v16 }
 0x3ca   :  { %v535_v13 = vmax.f32 %v525_v61, %v533_v34  ;;  %v201_v34 = vadd.f32 %v199_v30, %v185_v60  ;;  %v344_v61 = vmul.f32 %v339_v50, %v1889_v17 }
 0x3cb   :  { %v538_v40 = vpop.permute.xlu1 %537  ;;  %v540_v42 = vpop.permute.xlu0 %539 }
 0x3cc   :  { %v542_v58 = vsel %vm2094_vm6, %v540_v42, %v538_v40  ;;  %v541_v62 = vsel %vm2096_vm9, %v538_v40, %v540_v42  ;;  %v473_v40 = vmul.f32 %v468_v0, %v463_v22  ;;  %v208_v55 = vadd.f32 %v1893_v20, %v201_v34  ;;  %vm2107_vm6 = vmmov %vm2095_vm15 }
 0x3cd   :  { %v544_v14 = vsel %vm2099_vm10, %v542_v58, -inf  ;;  %v474_v58 = vmul.f32 %v472_v33, %v463_v22  ;;  %v360_v6 = vadd.f32 %v358_v26, %v344_v61 }
 0x3cf   :  { %v546_v63 = vpop.permute.xlu1 %545  ;;  %v548_v1 = vpop.permute.xlu0 %547  ;;  %v476_v60 = vadd.f32 %v474_v58, %v460_v35  ;;  %v362_v17 = vadd.f32 %v360_v6, %v207_v54 }
 0x3d0   :  { %v549_v44 = vsel %vm2097_vm7, %v546_v63, %v548_v1  ;;  %v550_v45 = vsel %vm2098_vm8, %v548_v1, %v546_v63  ;;  %v359_v63 = vmul.f32 %v357_v56, %v348_v18 }
 0x3d1   :  { %v552_v47 = vsel %vm2100_vm11, %v550_v45, -inf  ;;  %v553_v3 = vmax.f32 %v541_v62, %v549_v44  ;;  %v459_v62 = vmul.f32 %v454_v41, %v449_v16 }
 0x3d2   :  { %v554_v38 = vmax.f32 %v544_v14, %v552_v47  ;;  %v361_v41 = vadd.f32 %v359_v63, %v345_v4 }
 0x3d3   :  { %v555_v42 = vmax.f32 %v535_v13, %v553_v3  ;;  %v1018_v49 = vpop.permute.xlu1 %1017  ;;  %v1020_v43 = vpop.permute.xlu0 %1019  ;;  %v475_v59 = vadd.f32 %v473_v40, %v459_v62 }
 0x3d4   :  { %v556_v1 = vmax.f32 %v536_v23, %v554_v38 }
 0x3d5   :  { %v557_v24 = vmax.f32 %v555_v42, %v1797_v27  ;;  %v477_v45 = vadd.f32 %v475_v59, %v362_v17  ;;  %v1022_v42 = vsel %vm273_vm13, %v1020_v43, %v1018_v49 }
 0x3d6   :  { %v558_v0 = vmax.f32 %v556_v1, %v1800_v28  ;;  %v363_v28 = vadd.f32 %v361_v41, %v208_v55  ;;  %v1023_v4 = vsel %vm2107_vm6, %v1022_v42, -inf  ;;  %v724_v55 = vrot.slane %v1288_v46, %v1238_v8 }
 0x3d7   :  { %v569_v18 = vrot.slane %v557_v24, %v1238_v8  ;;  %v583_v22 = vrot.slane %v557_v24, %v1240_v10  ;;  %v1026_v56 = vpop.permute.xlu1 %1025  ;;  %v1028_v50 = vpop.permute.xlu0 %1027  ;;  %v856_v41 = vrot.slane %v1522_v7, %v1240_v10 }
 0x3d8   :  { %v573_v2 = vrot.slane %v558_v0, %v1238_v8  ;;  %v587_v27 = vrot.slane %v558_v0, %v1240_v10  ;;  %v478_v3 = vadd.f32 %v476_v60, %v363_v28  ;;  %v1030_v38 = vsel %vm286_vm12, %v1028_v50, %v1026_v56 }
 0x3d9   :  { %v574_v16 = vmul.f32 %v569_v18, %v1903_v39  ;;  %v588_v52 = vmul.f32 %v583_v22, %v1901_v32  ;;  %v1031_v58 = vsel %vm38_vm14, %v1030_v38, -inf  ;;  %v1029_v62 = vsel %vm286_vm12, %v1026_v56, %v1028_v50 }
 0x3da   :  { %v575_v57 = vmul.f32 %v573_v2, %v1903_v39  ;;  %v589_v44 = vmul.f32 %v587_v27, %v1901_v32  ;;  %v1021_v0 = vsel %vm273_vm13, %v1018_v49, %v1020_v43  ;;  %v1033_v6 = vmax.f32 %v1023_v4, %v1031_v58 }
 0x3db   :  { %v590_v13 = vadd.f32 %v588_v52, %v574_v16  ;;  %v1036_v14 = vpop.permute.xlu1 %1035  ;;  %v1038_v47 = vpop.permute.xlu0 %1037  ;;  %v1034_v59 = vmax.f32 %v1021_v0, %v1029_v62  ;;  %v738_v18 = vrot.slane %v1288_v46, %v1240_v10  ;;  %v729_v22 = vmul.f32 %v724_v55, %v1880_v12 }
 0x3dc   :  { %v591_v30 = vadd.f32 %v589_v44, %v575_v57  ;;  %v1040_v39 = vsel %vm2101_vm0, %v1038_v47, %v1036_v14  ;;  %v1039_v1 = vsel %vm2104_vm2, %v1036_v14, %v1038_v47  ;;  %v838_v56 = vrot.slane %v1519_v5, %v1238_v8 }
 0x3dd   :  { %v1969_v33 = vadd.f32 %v590_v13, %v477_v45  ;;  %v1042_v54 = vsel %vm2106_vm5, %v1040_v39, -inf  ;;  %v852_v50 = vrot.slane %v1519_v5, %v1240_v10  ;;  %v743_v48 = vmul.f32 %v738_v18, %v1870_v11 }
 0x3de   :  { %v1971_v23 = vadd.f32 %v591_v30, %v478_v3  ;;  %v842_v49 = vrot.slane %v1522_v7, %v1238_v8  ;;  %v966_v46 = vrot.slane %v1719_v36, %v1240_v10  ;;  %v970_v12 = vrot.slane %v1722_v37, %v1240_v10 }
 0x3df   :  { %v1117_v25 = vmul.f32 -1.442695, %v1969_v33  ;;  %v1044_v26 = vpop.permute.xlu1 %1043  ;;  %v1046_v32 = vpop.permute.xlu0 %1045  ;;  %v952_v43 = vrot.slane %v1719_v36, %v1238_v8  ;;  %v956_v5 = vrot.slane %v1722_v37, %v1238_v8  ;;  %v857_v2 = vmul.f32 %v852_v50, %v1891_v19 }
 0x3e0   :  { %v1118_v40 = vmul.f32 -1.442695, %v1971_v23  ;;  %v1047_v34 = vsel %vm2102_vm1, %v1044_v26, %v1046_v32  ;;  %v1048_v63 = vsel %vm2103_vm4, %v1046_v32, %v1044_v26  ;;  %v858_v27 = vmul.f32 %v856_v41, %v1891_v19 }
 0x3e1   :  { %1169 = vpow2.f32 %v1117_v25  ;;  %v1050_v61 = vsel %vm2105_vm3, %v1048_v63, -inf  ;;  %v1051_v24 = vmax.f32 %v1039_v1, %v1047_v34  ;;  %v745_v11 = vadd.f32 %v743_v48, %v729_v22 }
 0x3e2   :  { %1171 = vpow2.f32 %v1118_v40  ;;  %v1052_v35 = vmax.f32 %v1042_v54, %v1050_v61  ;;  %v971_v17 = vmul.f32 %v966_v46, %v1897_v29  ;;  %v972_v7 = vmul.f32 %v970_v12, %v1897_v29 }
 0x3e3   :  { %v1053_v51 = vmax.f32 %v1033_v6, %v1051_v24  ;;  %v843_v28 = vmul.f32 %v838_v56, %v1895_v21  ;;  %v844_v57 = vmul.f32 %v842_v49, %v1895_v21  ;;  %v957_v36 = vmul.f32 %v952_v43, %v1899_v31 }
 0x3e4   :  { %v1054_v60 = vmax.f32 %v1034_v59, %v1052_v35  ;;  %v958_v45 = vmul.f32 %v956_v5, %v1899_v31  ;;  %v747_v19 = vadd.f32 %v745_v11, %v1893_v20  ;;  %v748_v13 = vadd.f32 %v1884_v15, %v1893_v20 }
 0x3e5   :  { %v1055_v16 = vmax.f32 %v1053_v51, %v1851_v9  ;;  %v859_v14 = vadd.f32 %v857_v2, %v843_v28  ;;  %v860_v9 = vadd.f32 %v858_v27, %v844_v57  ;;  %v973_v3 = vadd.f32 %v971_v17, %v957_v36 }
 0x3e6   :  { %v1056_v37 = vmax.f32 %v1054_v60, %v1854_v53  ;;  %v974_v30 = vadd.f32 %v972_v7, %v958_v45 }
 0x3e7   :  { %v1080_v21 = vrot.slane %v1055_v16, %v1240_v10  ;;  %v1066_v38 = vrot.slane %v1055_v16, %v1238_v8  ;;  %v861_v25 = vadd.f32 %v859_v14, %v747_v19  ;;  %v862_v39 = vadd.f32 %v860_v9, %v748_v13 }
 0x3e8   :  { %v1084_v53 = vrot.slane %v1056_v37, %v1240_v10  ;;  %v1070_v31 = vrot.slane %v1056_v37, %v1238_v8 }
 0x3e9   :  { %v975_v34 = vadd.f32 %v973_v3, %v861_v25  ;;  %v976_v63 = vadd.f32 %v974_v30, %v862_v39 }
 0x3eb   :  { %v1170_v52 = vpop.eup %1169 }
 0x3ec   :  { %v1172_v44 = vpop.eup %1171  ;;  %v600_v29 = vadd.f32 1.0, %v1170_v52 }
 0x3ed   :  { %v601_v47 = vadd.f32 1.0, %v1172_v44 }
 0x3ee   :  { %1173 = vrcp.f32 %v600_v29 }
 0x3ef   :  { %1175 = vrcp.f32 %v601_v47 }
 0x3f0   :  { %v1075_v26 = vpop.permute.xlu1 %1074  ;;  %v1061_v15 = vpop.permute.xlu0 %1060 }
 0x3f1   :  { %v1085_v20 = vmul.f32 %v1080_v21, %v1075_v26  ;;  %v1086_v32 = vmul.f32 %v1084_v53, %v1075_v26  ;;  %v1071_v40 = vmul.f32 %v1066_v38, %v1061_v15  ;;  %v1072_v42 = vmul.f32 %v1070_v31, %v1061_v15 }
 0x3f3   :  { %v1087_v58 = vadd.f32 %v1085_v20, %v1071_v40  ;;  %v1088_v1 = vadd.f32 %v1086_v32, %v1072_v42 }
 0x3f5   :  { %v1089_v61 = vadd.f32 %v1087_v58, %v975_v34  ;;  %v1090_v62 = vadd.f32 %v1088_v1, %v976_v63 }
 0x3f7   :  { %v1125_v54 = vmul.f32 -1.442695, %v1089_v61  ;;  %v1126_v10 = vmul.f32 -1.442695, %v1090_v62 }
 0x3f8   :  { %v1174_v24 = vpop.eup %1173 }
 0x3f9   :  { %v1176_v4 = vpop.eup %1175  ;;  %v606_v8 = vmul.f32 %v1174_v24, %v1969_v33  ;;  %1177 = vpow2.f32 %v1125_v54 }
 0x3fa   :  { %v607_v35 = vmul.f32 %v1176_v4, %v1971_v23  ;;  %1179 = vpow2.f32 %v1126_v10 }
 0x3fb   :  { %608 = vst [vmem:[%s2057_s5] sm:$0xff] %v606_v8 }
 0x3fc   :  { %609 = vst [vmem:[%s2057_s5 + $0x8] sm:$0xff] %v607_v35 }
 0x403   :  { %v1178_v55 = vpop.eup %1177 }
 0x404   :  { %v1180_v0 = vpop.eup %1179  ;;  %v1097_v6 = vadd.f32 1.0, %v1178_v55 }
 0x405   :  { %v1098_v59 = vadd.f32 1.0, %v1180_v0 }
 0x406   :  { %1181 = vrcp.f32 %v1097_v6 }
 0x407   :  { %1183 = vrcp.f32 %v1098_v59 }
 0x410   :  { %v1182_v18 = vpop.eup %1181 }
 0x411   :  { %v1184_v33 = vpop.eup %1183  ;;  %v1103_v22 = vmul.f32 %v1182_v18, %v1089_v61 }
 0x412   :  { %v1104_v51 = vmul.f32 %v1184_v33, %v1090_v62 }
 0x413   :  { %1127 = vst [vmem:[%s2057_s5 + $0x10] sm:$0xff] %v1103_v22 }
 0x414   :  { %1128 = vst [vmem:[%s2057_s5 + $0x18] sm:$0xff] %v1104_v51 }

</bundles_post_ra>
